<compile_context>
chip_gen: v6e
topology: v6e:2x2x1
jax: 0.10.0
libtpu: 0.0.40
codegen_flags: <defaults>
</compile_context>

<pallas_src>
import functools

import jax
import jax.numpy as jnp
from jax.experimental import pallas as pl
from jax.experimental.pallas import tpu as pltpu


# ---------------------------------------------------------------------------
# Fused forward kernel
# ---------------------------------------------------------------------------

def _fused_gat_forward_kernel(x_ref, mask_ref, assign_ref, vec_ref,
                              fc1_w_ref, fc2_w_ref, *rest,
                              heads, head_dims, out_features, fc_hidden,
                              negative_slope=0.2, ln_eps=1e-5):
    """Entire forward pass on a (small) whole graph, VMEM-resident.

    x_ref:      [N, Fin]      bf16 node features
    mask_ref:   [N, N]        bf16 additive edge mask (0 on edge j->i, -1e30 off)
    assign_ref: [B, N]        bf16 pooling matrix, pre-scaled by 1/graph-size
    vec_ref:    [4+L, W]      f32 packed vectors:
                              row 0 ln_gamma, 1 ln_beta, 2 fc1_b, 3 fc2_b(padded),
                              rows 4+l: GAT layer-l bias
    fc1_w_ref:  [F, H1]       bf16
    fc2_w_ref:  [H1, C_pad]   bf16 (class dim zero-padded to 128-lane multiple)
    per layer l (in `rest`): w [Fin_l, H*D_l] bf16, a_cat [H*D_l, 2H] bf16
    out_ref:    [B, C_pad]    f32 (lane-dense store)
    """
    num_layers = len(head_dims)
    layer_refs = rest[:2 * num_layers]
    out_ref = rest[2 * num_layers]
    nc_pad = out_ref.shape[1]

    # Edge mask: loaded and widened exactly once, reused by every head/layer.
    mask_add = mask_ref[...].astype(jnp.float32)            # [N, N]

    feats_bf = x_ref[...]                                    # bf16 [N, Fin]
    feats = None

    for li in range(num_layers):
        w_ref, a_ref = layer_refs[2 * li:2 * li + 2]
        d = head_dims[li]
        last = (li == num_layers - 1)
        out_dim = d if last else heads * d
        b = vec_ref[4 + li:5 + li, :out_dim]                 # [1, out_dim] f32

        # One MXU dot per layer for the linear transform, one for all 2H
        # attention logits (block-diagonal a_cat built host-side).
        h = jnp.dot(feats_bf, w_ref[...],
                    preferred_element_type=jnp.float32)      # [N, H*D] f32
        h_bf = h.astype(jnp.bfloat16)                        # cast hoisted
        e = jnp.dot(h_bf, a_ref[...],
                    preferred_element_type=jnp.float32)      # [N, 2H] f32
        e_t = jnp.transpose(e)                               # [2H, N] (one XLU op)

        head_outs = []
        acc = None
        for hd in range(heads):                              # static unroll
            e_dst = e[:, hd:hd + 1]                          # [N, 1] target term
            e_src = e_t[heads + hd:heads + hd + 1]           # [1, N] source term
            s = e_dst + e_src                                # [N, N]
            s = jnp.maximum(s, negative_slope * s)           # LeakyReLU
            s = s + mask_add                                 # mask non-edges
            s = s - jnp.max(s, axis=1, keepdims=True)
            p = jnp.exp(s)                                   # unnormalized
            inv = pl.reciprocal(jnp.sum(p, axis=1, keepdims=True),
                                approx=True)                 # [N, 1] (EUP)
            hh_bf = h_bf[:, hd * d:(hd + 1) * d]             # [N, D] bf16 slice
            agg = jnp.dot(p.astype(jnp.bfloat16), hh_bf,
                          preferred_element_type=jnp.float32)
            agg = agg * inv                                  # normalize AFTER dot
            if last:
                acc = agg if acc is None else acc + agg
            else:
                head_outs.append(agg)

        if last:
            feats = acc * jnp.float32(1.0 / heads) + b       # average heads
        else:
            hid = jnp.concatenate(head_outs, axis=1) + b     # [N, H*D], one pass
            feats = jnp.where(hid > 0, hid,
                              jnp.exp(jnp.minimum(hid, 0.0)) - 1.0)   # ELU
        feats_bf = feats.astype(jnp.bfloat16)

    # LayerNorm (f32)
    ln_g = vec_ref[0:1, :out_features]
    ln_b = vec_ref[1:2, :out_features]
    mu = jnp.mean(feats, axis=-1, keepdims=True)
    xc = feats - mu
    var = jnp.mean(xc * xc, axis=-1, keepdims=True)
    normed = xc * jax.lax.rsqrt(var + ln_eps) * ln_g + ln_b

    # TODO(synk): dropout is identity at inference; no RNG masking applied.

    # global_mean_pool (mean already folded into assign), then fc1 -> ReLU -> fc2.
    pooled = jnp.dot(assign_ref[...], normed.astype(jnp.bfloat16),
                     preferred_element_type=jnp.float32)     # [B, F]
    fc1_b = vec_ref[2:3, :fc_hidden]
    hfc = jnp.maximum(jnp.dot(pooled.astype(jnp.bfloat16), fc1_w_ref[...],
                              preferred_element_type=jnp.float32) + fc1_b, 0.0)
    fc2_b = vec_ref[3:4, :nc_pad]
    out_ref[...] = jnp.dot(hfc.astype(jnp.bfloat16), fc2_w_ref[...],
                           preferred_element_type=jnp.float32) + fc2_b


# ---------------------------------------------------------------------------
# Wrapper: single pallas_call, everything whole-array in VMEM (small graph)
# ---------------------------------------------------------------------------

def advanced_gat_forward(params, x, adj, assign, inv_counts, *, heads):
    gat_layers = params["gat"]
    num_layers = len(gat_layers)
    head_dims = tuple(w.shape[1] // heads for (w, _a, _b) in gat_layers)

    out_features = params["fc1_w"].shape[0]
    fc_hidden = params["fc1_w"].shape[1]
    num_classes = params["fc2_w"].shape[1]
    nc_pad = -(-num_classes // 128) * 128            # lane-dense output store
    num_graphs = assign.shape[0]

    # ---- host-side prep: fewer, lighter inputs ----
    x_bf = x.astype(jnp.bfloat16)
    mask_add = jnp.where(adj > 0, 0.0, -1e30).astype(jnp.bfloat16)
    assign_scaled = (assign * inv_counts).astype(jnp.bfloat16)

    fc1_w = params["fc1_w"].astype(jnp.bfloat16)
    fc2_w = jnp.pad(params["fc2_w"],
                    ((0, 0), (0, nc_pad - num_classes))).astype(jnp.bfloat16)
    fc2_b = jnp.pad(params["fc2_b"], ((0, 0), (0, nc_pad - num_classes)))

    # Pack every [1, W] parameter vector into one f32 slab (one DMA).
    vec_width = max(128, out_features, fc_hidden, nc_pad)

    def _row(v):
        return jnp.pad(v, ((0, 0), (0, vec_width - v.shape[1])))

    rows = [_row(params["ln_gamma"]), _row(params["ln_beta"]),
            _row(params["fc1_b"]), _row(fc2_b)]
    layer_args = []
    for (w, a_cat, b) in gat_layers:
        rows.append(_row(b))
        layer_args.extend([w.astype(jnp.bfloat16), a_cat.astype(jnp.bfloat16)])
    vec_pack = jnp.concatenate(rows, axis=0)          # [4 + L, vec_width]

    kernel = functools.partial(_fused_gat_forward_kernel,
                               heads=heads, head_dims=head_dims,
                               out_features=out_features, fc_hidden=fc_hidden)
    n_inputs = 6 + 2 * num_layers

    out = pl.pallas_call(
        kernel,
        out_shape=jax.ShapeDtypeStruct((num_graphs, nc_pad), jnp.float32),
        in_specs=[pl.BlockSpec(memory_space=pltpu.MemorySpace.VMEM)] * n_inputs,
        out_specs=pl.BlockSpec(memory_space=pltpu.MemorySpace.VMEM),
    )(x_bf, mask_add, assign_scaled, vec_pack, fc1_w, fc2_w, *layer_args)

    return out[:, :num_classes]


# ---------------------------------------------------------------------------
# Deterministic parameter init + example inputs
# ---------------------------------------------------------------------------

def _make_a_cat(a_dst, a_src, heads, d):
    """Block-diagonal [H*D, 2H] attention matrix: e = h @ a_cat gives
    columns [0:H] = per-head target terms, [H:2H] = per-head source terms."""
    a_cat = jnp.zeros((heads * d, 2 * heads), jnp.float32)
    for hd in range(heads):
        a_cat = a_cat.at[hd * d:(hd + 1) * d, hd].set(a_dst[:, hd])
        a_cat = a_cat.at[hd * d:(hd + 1) * d, heads + hd].set(a_src[:, hd])
    return a_cat


def init_params(key, *, in_features, out_features, heads, num_layers,
                fc_hidden, num_classes):
    keys = iter(jax.random.split(key, 4 * num_layers + 4))
    hidden_per_head = out_features // heads

    gat = []
    fin = in_features
    for li in range(num_layers):
        last = (li == num_layers - 1)
        d = out_features if last else hidden_per_head
        out_dim = d if last else d * heads
        w = jax.random.normal(next(keys), (fin, heads * d), jnp.float32) * 0.1
        a_dst = jax.random.normal(next(keys), (d, heads), jnp.float32) * 0.1
        a_src = jax.random.normal(next(keys), (d, heads), jnp.float32) * 0.1
        a_cat = _make_a_cat(a_dst, a_src, heads, d)
        b = jnp.zeros((1, out_dim), jnp.float32)
        gat.append((w, a_cat, b))
        fin = out_dim

    fc1_w = jax.random.normal(next(keys), (out_features, fc_hidden),
                              jnp.float32) * 0.1
    fc1_b = jnp.zeros((1, fc_hidden), jnp.float32)
    fc2_w = jax.random.normal(next(keys), (fc_hidden, num_classes),
                              jnp.float32) * 0.1
    fc2_b = jnp.zeros((1, num_classes), jnp.float32)

    return {
        "gat": gat,
        "ln_gamma": jnp.ones((1, out_features), jnp.float32),
        "ln_beta": jnp.zeros((1, out_features), jnp.float32),
        "fc1_w": fc1_w, "fc1_b": fc1_b,
        "fc2_w": fc2_w, "fc2_b": fc2_b,
    }


if __name__ == "__main__":
    # Small shapes consistent with the module (scaled down):
    N_NODES, IN_F, OUT_F, HEADS, N_LAYERS = 16, 32, 64, 4, 2
    FC_HIDDEN, NUM_CLASSES, NUM_GRAPHS, N_EDGES = 128, 10, 2, 40

    key = jax.random.PRNGKey(0)
    k_x, k_src, k_dst, k_p = jax.random.split(key, 4)

    x = jax.random.normal(k_x, (N_NODES, IN_F), jnp.float32)

    # data.edge_index: [2, E]; data.batch: [N]
    src = jax.random.randint(k_src, (N_EDGES,), 0, N_NODES)
    dst = jax.random.randint(k_dst, (N_EDGES,), 0, N_NODES)
    batch = jnp.concatenate([jnp.zeros((N_NODES // 2,), jnp.int32),
                             jnp.ones((N_NODES - N_NODES // 2,), jnp.int32)])

    # Dense adjacency mask adj[i, j] = 1 iff edge j -> i, plus self-loops
    # (required so every softmax row has at least one nonzero entry).
    adj = jnp.zeros((N_NODES, N_NODES), jnp.float32).at[dst, src].set(1.0)
    adj = jnp.maximum(adj, jnp.eye(N_NODES, dtype=jnp.float32))

    # One-hot pooling matrix [B, N] and inverse graph sizes [B, 1].
    assign = jax.nn.one_hot(batch, NUM_GRAPHS, dtype=jnp.float32).T
    inv_counts = 1.0 / jnp.sum(assign, axis=1, keepdims=True)

    params = init_params(k_p, in_features=IN_F, out_features=OUT_F,
                         heads=HEADS, num_layers=N_LAYERS,
                         fc_hidden=FC_HIDDEN, num_classes=NUM_CLASSES)

    logits = advanced_gat_forward(params, x, adj, assign, inv_counts,
                                  heads=HEADS)
    logits = jax.block_until_ready(logits)
    assert logits.shape == (NUM_GRAPHS, NUM_CLASSES)
    assert bool(jnp.all(jnp.isfinite(logits)))
    print("KERNEL_OK")
</pallas_src>

<mosaic_0001>
module attributes {stable_mosaic.version = 11 : i64} {
  func.func @_fused_gat_forward_kernel(%arg0: memref<16x32xbf16, #tpu.memory_space<vmem>>, %arg1: memref<16x16xbf16, #tpu.memory_space<vmem>>, %arg2: memref<2x16xbf16, #tpu.memory_space<vmem>>, %arg3: memref<6x128xf32, #tpu.memory_space<vmem>>, %arg4: memref<64x128xbf16, #tpu.memory_space<vmem>>, %arg5: memref<128x128xbf16, #tpu.memory_space<vmem>>, %arg6: memref<32x64xbf16, #tpu.memory_space<vmem>>, %arg7: memref<64x8xbf16, #tpu.memory_space<vmem>>, %arg8: memref<64x256xbf16, #tpu.memory_space<vmem>>, %arg9: memref<256x8xbf16, #tpu.memory_space<vmem>>, %arg10: memref<2x128xf32, #tpu.memory_space<vmem>>) attributes {dimension_semantics = [], scalar_prefetch = 0 : i64, scratch_operands = 0 : i64, tpu.core_type = #tpu.core_type<tc>} {
    %c0 = arith.constant 0 : index
    %c0_0 = arith.constant 0 : index
    %0 = vector.load %arg1[%c0, %c0_0] : memref<16x16xbf16, #tpu.memory_space<vmem>>, vector<16x16xbf16>
    %1 = arith.extf %0 : vector<16x16xbf16> to vector<16x16xf32>
    %c0_1 = arith.constant 0 : index
    %c0_2 = arith.constant 0 : index
    %2 = vector.load %arg0[%c0_1, %c0_2] : memref<16x32xbf16, #tpu.memory_space<vmem>>, vector<16x32xbf16>
    %c4 = arith.constant 4 : index
    %c0_3 = arith.constant 0 : index
    %3 = vector.load %arg3[%c4, %c0_3] : memref<6x128xf32, #tpu.memory_space<vmem>>, vector<1x64xf32>
    %c0_4 = arith.constant 0 : index
    %c0_5 = arith.constant 0 : index
    %4 = vector.load %arg6[%c0_4, %c0_5] : memref<32x64xbf16, #tpu.memory_space<vmem>>, vector<32x64xbf16>
    %cst = arith.constant dense<0.000000e+00> : vector<16x64xf32>
    %5 = tpu.matmul %2, %4, %cst {dimension_numbers = #tpu.dot_dimension_numbers<[1], [0], [0], [1], [0, 0, 1, 1], [], []>} : vector<16x32xbf16>, vector<32x64xbf16>, vector<16x64xf32> -> vector<16x64xf32>
    %6 = arith.truncf %5 : vector<16x64xf32> to vector<16x64xbf16>
    %c0_6 = arith.constant 0 : index
    %c0_7 = arith.constant 0 : index
    %7 = vector.load %arg7[%c0_6, %c0_7] : memref<64x8xbf16, #tpu.memory_space<vmem>>, vector<64x8xbf16>
    %cst_8 = arith.constant dense<0.000000e+00> : vector<16x8xf32>
    %8 = tpu.matmul %6, %7, %cst_8 {dimension_numbers = #tpu.dot_dimension_numbers<[1], [0], [0], [1], [0, 0, 1, 1], [], []>} : vector<16x64xbf16>, vector<64x8xbf16>, vector<16x8xf32> -> vector<16x8xf32>
    %9 = tpu.transpose %8, [1, 0] : vector<16x8xf32> -> vector<8x16xf32>
    %10 = vector.extract_strided_slice %8 {offsets = [0, 0], sizes = [16, 1], strides = [1, 1]} : vector<16x8xf32> to vector<16x1xf32>
    %11 = vector.extract_strided_slice %9 {offsets = [4, 0], sizes = [1, 16], strides = [1, 1]} : vector<8x16xf32> to vector<1x16xf32>
    %12 = vector.broadcast %10 : vector<16x1xf32> to vector<16x16xf32>
    %13 = vector.broadcast %11 : vector<1x16xf32> to vector<16x16xf32>
    %14 = arith.addf %12, %13 : vector<16x16xf32>
    %cst_9 = arith.constant 2.000000e-01 : f32
    %15 = vector.broadcast %cst_9 : f32 to vector<16x16xf32>
    %16 = arith.mulf %15, %14 : vector<16x16xf32>
    %17 = arith.maximumf %14, %16 : vector<16x16xf32>
    %18 = arith.addf %17, %1 : vector<16x16xf32>
    %cst_10 = arith.constant dense<0xFF800000> : vector<16xf32>
    %19 = vector.multi_reduction <maximumf>, %18, %cst_10 [1] : vector<16x16xf32> to vector<16xf32>
    %20 = vector.shape_cast %19 : vector<16xf32> to vector<16x1xf32>
    %21 = vector.broadcast %20 : vector<16x1xf32> to vector<16x16xf32>
    %22 = arith.subf %18, %21 : vector<16x16xf32>
    %23 = math.exp %22 : vector<16x16xf32>
    %cst_11 = arith.constant dense<0.000000e+00> : vector<16xf32>
    %24 = vector.multi_reduction <add>, %23, %cst_11 [1] : vector<16x16xf32> to vector<16xf32>
    %25 = vector.shape_cast %24 : vector<16xf32> to vector<16x1xf32>
    %26 = tpu.reciprocal %25 {approx = true} : vector<16x1xf32> -> vector<16x1xf32>
    %27 = vector.extract_strided_slice %6 {offsets = [0, 0], sizes = [16, 16], strides = [1, 1]} : vector<16x64xbf16> to vector<16x16xbf16>
    %28 = arith.truncf %23 : vector<16x16xf32> to vector<16x16xbf16>
    %cst_12 = arith.constant dense<0.000000e+00> : vector<16x16xf32>
    %29 = tpu.matmul %28, %27, %cst_12 {dimension_numbers = #tpu.dot_dimension_numbers<[1], [0], [0], [1], [0, 0, 1, 1], [], []>} : vector<16x16xbf16>, vector<16x16xbf16>, vector<16x16xf32> -> vector<16x16xf32>
    %30 = vector.broadcast %26 : vector<16x1xf32> to vector<16x16xf32>
    %31 = arith.mulf %29, %30 : vector<16x16xf32>
    %32 = vector.extract_strided_slice %8 {offsets = [0, 1], sizes = [16, 1], strides = [1, 1]} : vector<16x8xf32> to vector<16x1xf32>
    %33 = vector.extract_strided_slice %9 {offsets = [5, 0], sizes = [1, 16], strides = [1, 1]} : vector<8x16xf32> to vector<1x16xf32>
    %34 = vector.broadcast %32 : vector<16x1xf32> to vector<16x16xf32>
    %35 = vector.broadcast %33 : vector<1x16xf32> to vector<16x16xf32>
    %36 = arith.addf %34, %35 : vector<16x16xf32>
    %cst_13 = arith.constant 2.000000e-01 : f32
    %37 = vector.broadcast %cst_13 : f32 to vector<16x16xf32>
    %38 = arith.mulf %37, %36 : vector<16x16xf32>
    %39 = arith.maximumf %36, %38 : vector<16x16xf32>
    %40 = arith.addf %39, %1 : vector<16x16xf32>
    %cst_14 = arith.constant dense<0xFF800000> : vector<16xf32>
    %41 = vector.multi_reduction <maximumf>, %40, %cst_14 [1] : vector<16x16xf32> to vector<16xf32>
    %42 = vector.shape_cast %41 : vector<16xf32> to vector<16x1xf32>
    %43 = vector.broadcast %42 : vector<16x1xf32> to vector<16x16xf32>
    %44 = arith.subf %40, %43 : vector<16x16xf32>
    %45 = math.exp %44 : vector<16x16xf32>
    %cst_15 = arith.constant dense<0.000000e+00> : vector<16xf32>
    %46 = vector.multi_reduction <add>, %45, %cst_15 [1] : vector<16x16xf32> to vector<16xf32>
    %47 = vector.shape_cast %46 : vector<16xf32> to vector<16x1xf32>
    %48 = tpu.reciprocal %47 {approx = true} : vector<16x1xf32> -> vector<16x1xf32>
    %49 = vector.extract_strided_slice %6 {offsets = [0, 16], sizes = [16, 16], strides = [1, 1]} : vector<16x64xbf16> to vector<16x16xbf16>
    %50 = arith.truncf %45 : vector<16x16xf32> to vector<16x16xbf16>
    %cst_16 = arith.constant dense<0.000000e+00> : vector<16x16xf32>
    %51 = tpu.matmul %50, %49, %cst_16 {dimension_numbers = #tpu.dot_dimension_numbers<[1], [0], [0], [1], [0, 0, 1, 1], [], []>} : vector<16x16xbf16>, vector<16x16xbf16>, vector<16x16xf32> -> vector<16x16xf32>
    %52 = vector.broadcast %48 : vector<16x1xf32> to vector<16x16xf32>
    %53 = arith.mulf %51, %52 : vector<16x16xf32>
    %54 = vector.extract_strided_slice %8 {offsets = [0, 2], sizes = [16, 1], strides = [1, 1]} : vector<16x8xf32> to vector<16x1xf32>
    %55 = vector.extract_strided_slice %9 {offsets = [6, 0], sizes = [1, 16], strides = [1, 1]} : vector<8x16xf32> to vector<1x16xf32>
    %56 = vector.broadcast %54 : vector<16x1xf32> to vector<16x16xf32>
    %57 = vector.broadcast %55 : vector<1x16xf32> to vector<16x16xf32>
    %58 = arith.addf %56, %57 : vector<16x16xf32>
    %cst_17 = arith.constant 2.000000e-01 : f32
    %59 = vector.broadcast %cst_17 : f32 to vector<16x16xf32>
    %60 = arith.mulf %59, %58 : vector<16x16xf32>
    %61 = arith.maximumf %58, %60 : vector<16x16xf32>
    %62 = arith.addf %61, %1 : vector<16x16xf32>
    %cst_18 = arith.constant dense<0xFF800000> : vector<16xf32>
    %63 = vector.multi_reduction <maximumf>, %62, %cst_18 [1] : vector<16x16xf32> to vector<16xf32>
    %64 = vector.shape_cast %63 : vector<16xf32> to vector<16x1xf32>
    %65 = vector.broadcast %64 : vector<16x1xf32> to vector<16x16xf32>
    %66 = arith.subf %62, %65 : vector<16x16xf32>
    %67 = math.exp %66 : vector<16x16xf32>
    %cst_19 = arith.constant dense<0.000000e+00> : vector<16xf32>
    %68 = vector.multi_reduction <add>, %67, %cst_19 [1] : vector<16x16xf32> to vector<16xf32>
    %69 = vector.shape_cast %68 : vector<16xf32> to vector<16x1xf32>
    %70 = tpu.reciprocal %69 {approx = true} : vector<16x1xf32> -> vector<16x1xf32>
    %71 = vector.extract_strided_slice %6 {offsets = [0, 32], sizes = [16, 16], strides = [1, 1]} : vector<16x64xbf16> to vector<16x16xbf16>
    %72 = arith.truncf %67 : vector<16x16xf32> to vector<16x16xbf16>
    %cst_20 = arith.constant dense<0.000000e+00> : vector<16x16xf32>
    %73 = tpu.matmul %72, %71, %cst_20 {dimension_numbers = #tpu.dot_dimension_numbers<[1], [0], [0], [1], [0, 0, 1, 1], [], []>} : vector<16x16xbf16>, vector<16x16xbf16>, vector<16x16xf32> -> vector<16x16xf32>
    %74 = vector.broadcast %70 : vector<16x1xf32> to vector<16x16xf32>
    %75 = arith.mulf %73, %74 : vector<16x16xf32>
    %76 = vector.extract_strided_slice %8 {offsets = [0, 3], sizes = [16, 1], strides = [1, 1]} : vector<16x8xf32> to vector<16x1xf32>
    %77 = vector.extract_strided_slice %9 {offsets = [7, 0], sizes = [1, 16], strides = [1, 1]} : vector<8x16xf32> to vector<1x16xf32>
    %78 = vector.broadcast %76 : vector<16x1xf32> to vector<16x16xf32>
    %79 = vector.broadcast %77 : vector<1x16xf32> to vector<16x16xf32>
    %80 = arith.addf %78, %79 : vector<16x16xf32>
    %cst_21 = arith.constant 2.000000e-01 : f32
    %81 = vector.broadcast %cst_21 : f32 to vector<16x16xf32>
    %82 = arith.mulf %81, %80 : vector<16x16xf32>
    %83 = arith.maximumf %80, %82 : vector<16x16xf32>
    %84 = arith.addf %83, %1 : vector<16x16xf32>
    %cst_22 = arith.constant dense<0xFF800000> : vector<16xf32>
    %85 = vector.multi_reduction <maximumf>, %84, %cst_22 [1] : vector<16x16xf32> to vector<16xf32>
    %86 = vector.shape_cast %85 : vector<16xf32> to vector<16x1xf32>
    %87 = vector.broadcast %86 : vector<16x1xf32> to vector<16x16xf32>
    %88 = arith.subf %84, %87 : vector<16x16xf32>
    %89 = math.exp %88 : vector<16x16xf32>
    %cst_23 = arith.constant dense<0.000000e+00> : vector<16xf32>
    %90 = vector.multi_reduction <add>, %89, %cst_23 [1] : vector<16x16xf32> to vector<16xf32>
    %91 = vector.shape_cast %90 : vector<16xf32> to vector<16x1xf32>
    %92 = tpu.reciprocal %91 {approx = true} : vector<16x1xf32> -> vector<16x1xf32>
    %93 = vector.extract_strided_slice %6 {offsets = [0, 48], sizes = [16, 16], strides = [1, 1]} : vector<16x64xbf16> to vector<16x16xbf16>
    %94 = arith.truncf %89 : vector<16x16xf32> to vector<16x16xbf16>
    %cst_24 = arith.constant dense<0.000000e+00> : vector<16x16xf32>
    %95 = tpu.matmul %94, %93, %cst_24 {dimension_numbers = #tpu.dot_dimension_numbers<[1], [0], [0], [1], [0, 0, 1, 1], [], []>} : vector<16x16xbf16>, vector<16x16xbf16>, vector<16x16xf32> -> vector<16x16xf32>
    %96 = vector.broadcast %92 : vector<16x1xf32> to vector<16x16xf32>
    %97 = arith.mulf %95, %96 : vector<16x16xf32>
    %98 = tpu.concatenate %31, %53, %75, %97 in 1 : vector<16x16xf32>, vector<16x16xf32>, vector<16x16xf32>, vector<16x16xf32> -> vector<16x64xf32>
    %99 = vector.broadcast %3 : vector<1x64xf32> to vector<16x64xf32>
    %100 = arith.addf %98, %99 : vector<16x64xf32>
    %cst_25 = arith.constant 0.000000e+00 : f32
    %101 = vector.broadcast %cst_25 : f32 to vector<16x64xf32>
    %102 = arith.cmpf ogt, %100, %101 : vector<16x64xf32>
    %cst_26 = arith.constant 0.000000e+00 : f32
    %103 = vector.broadcast %cst_26 : f32 to vector<16x64xf32>
    %104 = arith.minimumf %100, %103 : vector<16x64xf32>
    %105 = math.exp %104 : vector<16x64xf32>
    %cst_27 = arith.constant 1.000000e+00 : f32
    %106 = vector.broadcast %cst_27 : f32 to vector<16x64xf32>
    %107 = arith.subf %105, %106 : vector<16x64xf32>
    %108 = arith.select %102, %100, %107 : vector<16x64xi1>, vector<16x64xf32>
    %109 = arith.truncf %108 : vector<16x64xf32> to vector<16x64xbf16>
    %c5 = arith.constant 5 : index
    %c0_28 = arith.constant 0 : index
    %110 = vector.load %arg3[%c5, %c0_28] : memref<6x128xf32, #tpu.memory_space<vmem>>, vector<1x64xf32>
    %c0_29 = arith.constant 0 : index
    %c0_30 = arith.constant 0 : index
    %111 = vector.load %arg8[%c0_29, %c0_30] : memref<64x256xbf16, #tpu.memory_space<vmem>>, vector<64x256xbf16>
    %cst_31 = arith.constant dense<0.000000e+00> : vector<16x256xf32>
    %112 = tpu.matmul %109, %111, %cst_31 {dimension_numbers = #tpu.dot_dimension_numbers<[1], [0], [0], [1], [0, 0, 1, 1], [], []>} : vector<16x64xbf16>, vector<64x256xbf16>, vector<16x256xf32> -> vector<16x256xf32>
    %113 = arith.truncf %112 : vector<16x256xf32> to vector<16x256xbf16>
    %c0_32 = arith.constant 0 : index
    %c0_33 = arith.constant 0 : index
    %114 = vector.load %arg9[%c0_32, %c0_33] : memref<256x8xbf16, #tpu.memory_space<vmem>>, vector<256x8xbf16>
    %cst_34 = arith.constant dense<0.000000e+00> : vector<16x8xf32>
    %115 = tpu.matmul %113, %114, %cst_34 {dimension_numbers = #tpu.dot_dimension_numbers<[1], [0], [0], [1], [0, 0, 1, 1], [], []>} : vector<16x256xbf16>, vector<256x8xbf16>, vector<16x8xf32> -> vector<16x8xf32>
    %116 = tpu.transpose %115, [1, 0] : vector<16x8xf32> -> vector<8x16xf32>
    %117 = vector.extract_strided_slice %115 {offsets = [0, 0], sizes = [16, 1], strides = [1, 1]} : vector<16x8xf32> to vector<16x1xf32>
    %118 = vector.extract_strided_slice %116 {offsets = [4, 0], sizes = [1, 16], strides = [1, 1]} : vector<8x16xf32> to vector<1x16xf32>
    %119 = vector.broadcast %117 : vector<16x1xf32> to vector<16x16xf32>
    %120 = vector.broadcast %118 : vector<1x16xf32> to vector<16x16xf32>
    %121 = arith.addf %119, %120 : vector<16x16xf32>
    %cst_35 = arith.constant 2.000000e-01 : f32
    %122 = vector.broadcast %cst_35 : f32 to vector<16x16xf32>
    %123 = arith.mulf %122, %121 : vector<16x16xf32>
    %124 = arith.maximumf %121, %123 : vector<16x16xf32>
    %125 = arith.addf %124, %1 : vector<16x16xf32>
    %cst_36 = arith.constant dense<0xFF800000> : vector<16xf32>
    %126 = vector.multi_reduction <maximumf>, %125, %cst_36 [1] : vector<16x16xf32> to vector<16xf32>
    %127 = vector.shape_cast %126 : vector<16xf32> to vector<16x1xf32>
    %128 = vector.broadcast %127 : vector<16x1xf32> to vector<16x16xf32>
    %129 = arith.subf %125, %128 : vector<16x16xf32>
    %130 = math.exp %129 : vector<16x16xf32>
    %cst_37 = arith.constant dense<0.000000e+00> : vector<16xf32>
    %131 = vector.multi_reduction <add>, %130, %cst_37 [1] : vector<16x16xf32> to vector<16xf32>
    %132 = vector.shape_cast %131 : vector<16xf32> to vector<16x1xf32>
    %133 = tpu.reciprocal %132 {approx = true} : vector<16x1xf32> -> vector<16x1xf32>
    %134 = vector.extract_strided_slice %113 {offsets = [0, 0], sizes = [16, 64], strides = [1, 1]} : vector<16x256xbf16> to vector<16x64xbf16>
    %135 = arith.truncf %130 : vector<16x16xf32> to vector<16x16xbf16>
    %cst_38 = arith.constant dense<0.000000e+00> : vector<16x64xf32>
    %136 = tpu.matmul %135, %134, %cst_38 {dimension_numbers = #tpu.dot_dimension_numbers<[1], [0], [0], [1], [0, 0, 1, 1], [], []>} : vector<16x16xbf16>, vector<16x64xbf16>, vector<16x64xf32> -> vector<16x64xf32>
    %137 = vector.broadcast %133 : vector<16x1xf32> to vector<16x64xf32>
    %138 = arith.mulf %136, %137 : vector<16x64xf32>
    %139 = vector.extract_strided_slice %115 {offsets = [0, 1], sizes = [16, 1], strides = [1, 1]} : vector<16x8xf32> to vector<16x1xf32>
    %140 = vector.extract_strided_slice %116 {offsets = [5, 0], sizes = [1, 16], strides = [1, 1]} : vector<8x16xf32> to vector<1x16xf32>
    %141 = vector.broadcast %139 : vector<16x1xf32> to vector<16x16xf32>
    %142 = vector.broadcast %140 : vector<1x16xf32> to vector<16x16xf32>
    %143 = arith.addf %141, %142 : vector<16x16xf32>
    %cst_39 = arith.constant 2.000000e-01 : f32
    %144 = vector.broadcast %cst_39 : f32 to vector<16x16xf32>
    %145 = arith.mulf %144, %143 : vector<16x16xf32>
    %146 = arith.maximumf %143, %145 : vector<16x16xf32>
    %147 = arith.addf %146, %1 : vector<16x16xf32>
    %cst_40 = arith.constant dense<0xFF800000> : vector<16xf32>
    %148 = vector.multi_reduction <maximumf>, %147, %cst_40 [1] : vector<16x16xf32> to vector<16xf32>
    %149 = vector.shape_cast %148 : vector<16xf32> to vector<16x1xf32>
    %150 = vector.broadcast %149 : vector<16x1xf32> to vector<16x16xf32>
    %151 = arith.subf %147, %150 : vector<16x16xf32>
    %152 = math.exp %151 : vector<16x16xf32>
    %cst_41 = arith.constant dense<0.000000e+00> : vector<16xf32>
    %153 = vector.multi_reduction <add>, %152, %cst_41 [1] : vector<16x16xf32> to vector<16xf32>
    %154 = vector.shape_cast %153 : vector<16xf32> to vector<16x1xf32>
    %155 = tpu.reciprocal %154 {approx = true} : vector<16x1xf32> -> vector<16x1xf32>
    %156 = vector.extract_strided_slice %113 {offsets = [0, 64], sizes = [16, 64], strides = [1, 1]} : vector<16x256xbf16> to vector<16x64xbf16>
    %157 = arith.truncf %152 : vector<16x16xf32> to vector<16x16xbf16>
    %cst_42 = arith.constant dense<0.000000e+00> : vector<16x64xf32>
    %158 = tpu.matmul %157, %156, %cst_42 {dimension_numbers = #tpu.dot_dimension_numbers<[1], [0], [0], [1], [0, 0, 1, 1], [], []>} : vector<16x16xbf16>, vector<16x64xbf16>, vector<16x64xf32> -> vector<16x64xf32>
    %159 = vector.broadcast %155 : vector<16x1xf32> to vector<16x64xf32>
    %160 = arith.mulf %158, %159 : vector<16x64xf32>
    %161 = arith.addf %138, %160 : vector<16x64xf32>
    %162 = vector.extract_strided_slice %115 {offsets = [0, 2], sizes = [16, 1], strides = [1, 1]} : vector<16x8xf32> to vector<16x1xf32>
    %163 = vector.extract_strided_slice %116 {offsets = [6, 0], sizes = [1, 16], strides = [1, 1]} : vector<8x16xf32> to vector<1x16xf32>
    %164 = vector.broadcast %162 : vector<16x1xf32> to vector<16x16xf32>
    %165 = vector.broadcast %163 : vector<1x16xf32> to vector<16x16xf32>
    %166 = arith.addf %164, %165 : vector<16x16xf32>
    %cst_43 = arith.constant 2.000000e-01 : f32
    %167 = vector.broadcast %cst_43 : f32 to vector<16x16xf32>
    %168 = arith.mulf %167, %166 : vector<16x16xf32>
    %169 = arith.maximumf %166, %168 : vector<16x16xf32>
    %170 = arith.addf %169, %1 : vector<16x16xf32>
    %cst_44 = arith.constant dense<0xFF800000> : vector<16xf32>
    %171 = vector.multi_reduction <maximumf>, %170, %cst_44 [1] : vector<16x16xf32> to vector<16xf32>
    %172 = vector.shape_cast %171 : vector<16xf32> to vector<16x1xf32>
    %173 = vector.broadcast %172 : vector<16x1xf32> to vector<16x16xf32>
    %174 = arith.subf %170, %173 : vector<16x16xf32>
    %175 = math.exp %174 : vector<16x16xf32>
    %cst_45 = arith.constant dense<0.000000e+00> : vector<16xf32>
    %176 = vector.multi_reduction <add>, %175, %cst_45 [1] : vector<16x16xf32> to vector<16xf32>
    %177 = vector.shape_cast %176 : vector<16xf32> to vector<16x1xf32>
    %178 = tpu.reciprocal %177 {approx = true} : vector<16x1xf32> -> vector<16x1xf32>
    %179 = vector.extract_strided_slice %113 {offsets = [0, 128], sizes = [16, 64], strides = [1, 1]} : vector<16x256xbf16> to vector<16x64xbf16>
    %180 = arith.truncf %175 : vector<16x16xf32> to vector<16x16xbf16>
    %cst_46 = arith.constant dense<0.000000e+00> : vector<16x64xf32>
    %181 = tpu.matmul %180, %179, %cst_46 {dimension_numbers = #tpu.dot_dimension_numbers<[1], [0], [0], [1], [0, 0, 1, 1], [], []>} : vector<16x16xbf16>, vector<16x64xbf16>, vector<16x64xf32> -> vector<16x64xf32>
    %182 = vector.broadcast %178 : vector<16x1xf32> to vector<16x64xf32>
    %183 = arith.mulf %181, %182 : vector<16x64xf32>
    %184 = arith.addf %161, %183 : vector<16x64xf32>
    %185 = vector.extract_strided_slice %115 {offsets = [0, 3], sizes = [16, 1], strides = [1, 1]} : vector<16x8xf32> to vector<16x1xf32>
    %186 = vector.extract_strided_slice %116 {offsets = [7, 0], sizes = [1, 16], strides = [1, 1]} : vector<8x16xf32> to vector<1x16xf32>
    %187 = vector.broadcast %185 : vector<16x1xf32> to vector<16x16xf32>
    %188 = vector.broadcast %186 : vector<1x16xf32> to vector<16x16xf32>
    %189 = arith.addf %187, %188 : vector<16x16xf32>
    %cst_47 = arith.constant 2.000000e-01 : f32
    %190 = vector.broadcast %cst_47 : f32 to vector<16x16xf32>
    %191 = arith.mulf %190, %189 : vector<16x16xf32>
    %192 = arith.maximumf %189, %191 : vector<16x16xf32>
    %193 = arith.addf %192, %1 : vector<16x16xf32>
    %cst_48 = arith.constant dense<0xFF800000> : vector<16xf32>
    %194 = vector.multi_reduction <maximumf>, %193, %cst_48 [1] : vector<16x16xf32> to vector<16xf32>
    %195 = vector.shape_cast %194 : vector<16xf32> to vector<16x1xf32>
    %196 = vector.broadcast %195 : vector<16x1xf32> to vector<16x16xf32>
    %197 = arith.subf %193, %196 : vector<16x16xf32>
    %198 = math.exp %197 : vector<16x16xf32>
    %cst_49 = arith.constant dense<0.000000e+00> : vector<16xf32>
    %199 = vector.multi_reduction <add>, %198, %cst_49 [1] : vector<16x16xf32> to vector<16xf32>
    %200 = vector.shape_cast %199 : vector<16xf32> to vector<16x1xf32>
    %201 = tpu.reciprocal %200 {approx = true} : vector<16x1xf32> -> vector<16x1xf32>
    %202 = vector.extract_strided_slice %113 {offsets = [0, 192], sizes = [16, 64], strides = [1, 1]} : vector<16x256xbf16> to vector<16x64xbf16>
    %203 = arith.truncf %198 : vector<16x16xf32> to vector<16x16xbf16>
    %cst_50 = arith.constant dense<0.000000e+00> : vector<16x64xf32>
    %204 = tpu.matmul %203, %202, %cst_50 {dimension_numbers = #tpu.dot_dimension_numbers<[1], [0], [0], [1], [0, 0, 1, 1], [], []>} : vector<16x16xbf16>, vector<16x64xbf16>, vector<16x64xf32> -> vector<16x64xf32>
    %205 = vector.broadcast %201 : vector<16x1xf32> to vector<16x64xf32>
    %206 = arith.mulf %204, %205 : vector<16x64xf32>
    %207 = arith.addf %184, %206 : vector<16x64xf32>
    %cst_51 = arith.constant 2.500000e-01 : f32
    %208 = vector.broadcast %cst_51 : f32 to vector<16x64xf32>
    %209 = arith.mulf %207, %208 : vector<16x64xf32>
    %210 = vector.broadcast %110 : vector<1x64xf32> to vector<16x64xf32>
    %211 = arith.addf %209, %210 : vector<16x64xf32>
    %c0_52 = arith.constant 0 : index
    %c0_53 = arith.constant 0 : index
    %212 = vector.load %arg3[%c0_52, %c0_53] : memref<6x128xf32, #tpu.memory_space<vmem>>, vector<1x64xf32>
    %c1 = arith.constant 1 : index
    %c0_54 = arith.constant 0 : index
    %213 = vector.load %arg3[%c1, %c0_54] : memref<6x128xf32, #tpu.memory_space<vmem>>, vector<1x64xf32>
    %cst_55 = arith.constant dense<0.000000e+00> : vector<16xf32>
    %214 = vector.multi_reduction <add>, %211, %cst_55 [1] : vector<16x64xf32> to vector<16xf32>
    %215 = vector.shape_cast %214 : vector<16xf32> to vector<16x1xf32>
    %cst_56 = arith.constant 6.400000e+01 : f32
    %216 = vector.broadcast %cst_56 : f32 to vector<16x1xf32>
    %217 = arith.divf %215, %216 : vector<16x1xf32>
    %218 = vector.broadcast %217 : vector<16x1xf32> to vector<16x64xf32>
    %219 = arith.subf %211, %218 : vector<16x64xf32>
    %220 = arith.mulf %219, %219 : vector<16x64xf32>
    %cst_57 = arith.constant dense<0.000000e+00> : vector<16xf32>
    %221 = vector.multi_reduction <add>, %220, %cst_57 [1] : vector<16x64xf32> to vector<16xf32>
    %222 = vector.shape_cast %221 : vector<16xf32> to vector<16x1xf32>
    %cst_58 = arith.constant 6.400000e+01 : f32
    %223 = vector.broadcast %cst_58 : f32 to vector<16x1xf32>
    %224 = arith.divf %222, %223 : vector<16x1xf32>
    %cst_59 = arith.constant 9.99999974E-6 : f32
    %225 = vector.broadcast %cst_59 : f32 to vector<16x1xf32>
    %226 = arith.addf %224, %225 : vector<16x1xf32>
    %227 = math.rsqrt %226 : vector<16x1xf32>
    %228 = vector.broadcast %227 : vector<16x1xf32> to vector<16x64xf32>
    %229 = arith.mulf %219, %228 : vector<16x64xf32>
    %230 = vector.broadcast %212 : vector<1x64xf32> to vector<16x64xf32>
    %231 = arith.mulf %229, %230 : vector<16x64xf32>
    %232 = vector.broadcast %213 : vector<1x64xf32> to vector<16x64xf32>
    %233 = arith.addf %231, %232 : vector<16x64xf32>
    %c0_60 = arith.constant 0 : index
    %c0_61 = arith.constant 0 : index
    %234 = vector.load %arg2[%c0_60, %c0_61] : memref<2x16xbf16, #tpu.memory_space<vmem>>, vector<2x16xbf16>
    %235 = arith.truncf %233 : vector<16x64xf32> to vector<16x64xbf16>
    %cst_62 = arith.constant dense<0.000000e+00> : vector<2x64xf32>
    %236 = tpu.matmul %234, %235, %cst_62 {dimension_numbers = #tpu.dot_dimension_numbers<[1], [0], [0], [1], [0, 0, 1, 1], [], []>} : vector<2x16xbf16>, vector<16x64xbf16>, vector<2x64xf32> -> vector<2x64xf32>
    %c2 = arith.constant 2 : index
    %c0_63 = arith.constant 0 : index
    %237 = vector.load %arg3[%c2, %c0_63] : memref<6x128xf32, #tpu.memory_space<vmem>>, vector<1x128xf32>
    %238 = arith.truncf %236 : vector<2x64xf32> to vector<2x64xbf16>
    %c0_64 = arith.constant 0 : index
    %c0_65 = arith.constant 0 : index
    %239 = vector.load %arg4[%c0_64, %c0_65] : memref<64x128xbf16, #tpu.memory_space<vmem>>, vector<64x128xbf16>
    %cst_66 = arith.constant dense<0.000000e+00> : vector<2x128xf32>
    %240 = tpu.matmul %238, %239, %cst_66 {dimension_numbers = #tpu.dot_dimension_numbers<[1], [0], [0], [1], [0, 0, 1, 1], [], []>} : vector<2x64xbf16>, vector<64x128xbf16>, vector<2x128xf32> -> vector<2x128xf32>
    %241 = vector.broadcast %237 : vector<1x128xf32> to vector<2x128xf32>
    %242 = arith.addf %240, %241 : vector<2x128xf32>
    %cst_67 = arith.constant 0.000000e+00 : f32
    %243 = vector.broadcast %cst_67 : f32 to vector<2x128xf32>
    %244 = arith.maximumf %242, %243 : vector<2x128xf32>
    %c3 = arith.constant 3 : index
    %c0_68 = arith.constant 0 : index
    %245 = vector.load %arg3[%c3, %c0_68] : memref<6x128xf32, #tpu.memory_space<vmem>>, vector<1x128xf32>
    %246 = arith.truncf %244 : vector<2x128xf32> to vector<2x128xbf16>
    %c0_69 = arith.constant 0 : index
    %c0_70 = arith.constant 0 : index
    %247 = vector.load %arg5[%c0_69, %c0_70] : memref<128x128xbf16, #tpu.memory_space<vmem>>, vector<128x128xbf16>
    %cst_71 = arith.constant dense<0.000000e+00> : vector<2x128xf32>
    %248 = tpu.matmul %246, %247, %cst_71 {dimension_numbers = #tpu.dot_dimension_numbers<[1], [0], [0], [1], [0, 0, 1, 1], [], []>} : vector<2x128xbf16>, vector<128x128xbf16>, vector<2x128xf32> -> vector<2x128xf32>
    %249 = vector.broadcast %245 : vector<1x128xf32> to vector<2x128xf32>
    %250 = arith.addf %248, %249 : vector<2x128xf32>
    %c0_72 = arith.constant 0 : index
    %c0_73 = arith.constant 0 : index
    %251 = vector.load %arg10[%c0_72, %c0_73] : memref<2x128xf32, #tpu.memory_space<vmem>>, vector<2x128xf32>
    tpu.vector_store %arg10[%c0_72, %c0_73], %250 {strides = array<i32>} : memref<2x128xf32, #tpu.memory_space<vmem>>, vector<2x128xf32>,
    return
  }
}

</mosaic_0001>

<bundles_post_ra>
// kernel: tpu_custom_call.1
= control target key start
LH: loop header
LB: loop body
LE: loop exit
PB: predicated region body
PF: predicated region fallthrough
CT: control target
= control target key end

     0   :  { %15 = vsyncpa [#allocation3], 0  ;;  %s2554_s0 = inlined_call_operand.hbm [shape: bf16[16,32], index: 0, kind: input, shape index: {}]   ;;  %s2555_s1 = inlined_call_operand.hbm [shape: bf16[16,16], index: 1, kind: input, shape index: {}]   ;;  %s2556_s2 = inlined_call_operand.hbm [shape: bf16[2,16], index: 2, kind: input, shape index: {}]   ;;  %s2557_s3 = inlined_call_operand.hbm [shape: f32[6,128], index: 3, kind: input, shape index: {}]   ;;  %s2558_s4 = inlined_call_operand.vmem [shape: bf16[64,128], index: 4, kind: input, shape index: {}]   ;;  %s2559_s5 = inlined_call_operand.vmem [shape: bf16[128,128], index: 5, kind: input, shape index: {}]   ;;  %s2560_s6 = inlined_call_operand.vmem [shape: bf16[32,64], index: 6, kind: input, shape index: {}]   ;;  %s2561_s7 = inlined_call_operand.vmem [shape: bf16[64,8], index: 7, kind: input, shape index: {}]   ;;  %s2562_s8 = inlined_call_operand.vmem [shape: bf16[64,256], index: 8, kind: input, shape index: {}]   ;;  %s2563_s9 = inlined_call_operand.vmem [shape: bf16[256,8], index: 9, kind: input, shape index: {}]   ;;  %s2564_s10 = inlined_call_operand.hbm [shape: f32[2,128], index: 10, kind: output, shape index: {}]  }
   0x1   :  { %16 = vsyncpa [#allocation6], 0 }
   0x2   :  { %17 = vsyncpa [#allocation9], 0 }
   0x3   :  { %18 = vsyncpa [#allocation4], 0  ;;  %s2146_s13 = smov [#allocation5]   ;;  %s2147_s15 = smov [#allocation2]  }
   0x4   :  { %s36_s14 = sshll.u32 %s2146_s13, 4  ;;  %s24_s16 = sshll.u32 %s2147_s15, 4  ;;  %s37_s14 = int_to_ptr.vmem [resolvable:$true] %s36_s14  ;;  %s25_s16 = int_to_ptr.vmem [resolvable:$true] %s24_s16 }
   0x5   :  { %s2046_s17 = scalar_lea.vmem %s37_s14, 128  ;;  %p2051_p1 = scmp.lt.s32.totalorder %s37_s14, %s37_s14 }
   0x6   :  { %p2047_p0 = scmp.ne.s32.totalorder %s37_s14, %s2046_s17  ;;  %p2052_p2 = scmp.lt.s32.totalorder %s2046_s17, %s2046_s17 }
   0x8   :  { %p2053_p3 = por %p2052_p2, %p2051_p1 }
   0xa   :  { %p2054_p4 = pnand %p2053_p3, %p2047_p0 }
   0xc   :  { %2057 = shalt.err (!%p2054_p4)
}
   0xd   :  { %s2148_s18 = smov 64   ;;  %s2149_s19 = smov 4  }
   0xe   :  { %42 = dma.hbm_to_vmem [thread:$0]  %s2555_s1, 128, %s37_s14, [#allocation6], %s2148_s18, %s2148_s18, %s2149_s19  }
   0xf   :  { %s2066_s22 = scalar_lea.vmem %s25_s16, 128  ;;  %p2071_p6 = scmp.lt.s32.totalorder %s25_s16, %s25_s16 }
  0x10   :  { %p2067_p5 = scmp.ne.s32.totalorder %s25_s16, %s2066_s22  ;;  %p2072_p7 = scmp.lt.s32.totalorder %s2066_s22, %s2066_s22 }
  0x12   :  { %p2073_p8 = por %p2072_p7, %p2071_p6 }
  0x14   :  { %p2074_p9 = pnand %p2073_p8, %p2067_p5 }
  0x16   :  { %2077 = shalt.err (!%p2074_p9)
}
  0x17   :  { %30 = dma.hbm_to_vmem [thread:$0]  %s2554_s0, 128, %s25_s16, [#allocation3], %s2148_s18, %s2148_s18, %s2149_s19  }
  0x18   :  { %s2150_s25 = smov [#allocation7]   ;;  %s2151_s27 = smov [#allocation8]  }
  0x19   :  { %s49_s26 = sshll.u32 %s2150_s25, 4  ;;  %s59_s28 = sshll.u32 %s2151_s27, 4  ;;  %s50_s26 = int_to_ptr.vmem [resolvable:$true] %s49_s26  ;;  %s60_s28 = int_to_ptr.vmem [resolvable:$true] %s59_s28 }
  0x1a   :  { %s2086_s1 = scalar_lea.vmem %s50_s26, 16  ;;  %s2090_s29 = scalar_lea.vmem %s50_s26, 32 }
  0x1b   :  { %p2087_p10 = scmp.ne.s32.totalorder %s50_s26, %s2086_s1  ;;  %p2091_p11 = scmp.lt.s32.totalorder %s50_s26, %s50_s26 }
  0x1c   :  { %p2092_p12 = scmp.lt.s32.totalorder %s2090_s29, %s2086_s1 }
  0x1e   :  { %p2093_p13 = por %p2092_p12, %p2091_p11 }
  0x20   :  { %p2094_p0 = pnand %p2093_p13, %p2087_p10 }
  0x22   :  { %2097 = shalt.err (!%p2094_p0)
}
  0x23   :  { %52 = dma.hbm_to_vmem [thread:$0]  %s2556_s2, 16, %s50_s26, [#allocation6]  }
  0x24   :  { %s2106_s12 = scalar_lea.vmem %s60_s28, 128  ;;  %p2111_p2 = scmp.lt.s32.totalorder %s60_s28, %s60_s28 }
  0x25   :  { %p2107_p1 = scmp.ne.s32.totalorder %s60_s28, %s2106_s12  ;;  %p2112_p3 = scmp.lt.s32.totalorder %s2106_s12, %s2106_s12 }
  0x27   :  { %p2113_p4 = por %p2112_p3, %p2111_p2 }
  0x29   :  { %p2114_p5 = pnand %p2113_p4, %p2107_p1 }
  0x2b   :  { %2117 = shalt.err (!%p2114_p5)
}
  0x2c   :  { %62 = dma.hbm_to_vmem [thread:$0]  %s2557_s3, 128, %s60_s28, [#allocation9]  }
  0x2d   :  { %2138 = dma.done.wait [#allocation3], 128  }
  0x2e   :  { %2139 = vsyncadd [#allocation3], 4294967168 }
  0x2f   :  { %2140 = dma.done.wait [#allocation6], 144  }
  0x30   :  { %2141 = vsyncadd [#allocation6], 4294967152 }
  0x31   :  { %2142 = dma.done.wait [#allocation9], 128  }
  0x32   :  { %2143 = vsyncadd [#allocation9], 4294967168  ;;  %v2152_v0 = vmov 0.0   ;;  %vm2153_vm0 = vmmov 0   ;;  %v1919_v1 = vld [vmem:[%s2560_s6 + $0x8] sm:$0xff]   ;;  %v1920_v2 = vld [vmem:[%s2560_s6] sm:$0xff]   ;;  %v281_v23 = vlaneseq }
  0x33   :  { %1778 = vmatprep.subr.bf16.mxu0 %v2152_v0  ;;  %1782 = vmatprep.mubr.msk.bf16.mxu0 %vm2153_vm0, %v2152_v0  ;;  %v1921_v3 = vld [vmem:[#allocation2] sm:$0xff]   ;;  %v1922_v4 = vld [vmem:[%s2561_s7 + $0x18] sm:$0xff]   ;;  %v1923_v5 = vld [vmem:[%s2561_s7 + $0x10] sm:$0xff]   ;;  %vm116_vm1 = vcmask 261120   ;;  %v2154_v8 = vmov 1   ;;  %v2155_v9 = vmov 0  }
  0x34   :  { %1786 = vmatprep.subr.bf16.mxu1 %v2152_v0  ;;  %1794 = vmatprep.mubr.msk.bf16.mxu1 %vm2153_vm0, %v2152_v0  ;;  %v1924_v6 = vld [vmem:[%s2561_s7 + $0x8] sm:$0xff]   ;;  %v1925_v7 = vld [vmem:[%s2561_s7] sm:$0xff]   ;;  %vm194_vm2 = vcmask 523264   ;;  %v2156_v18 = vmov 3   ;;  %v2157_v19 = vmov 2   ;;  %v2280_v26 = vshrl.u32 %v281_v23, 7 }
  0x35   :  { %1779 = vmatpush3.bf16.msra.mxu0 %v1919_v1  ;;  %1787 = vmatpush3.bf16.msra.mxu1 %v1922_v4  ;;  %v1713_v35 = vld [vmem:[#allocation5] sm:$0xff]   ;;  %vm293_vm3 = vcmask 130048   ;;  %s2158_s7 = smov 96   ;;  %s2159_s24 = smov 112   ;;  %vm660_vm4 = vcmask 392192  }
  0x36   :  { %1780 = vmatprep.subr.bf16.mxu0 %v2152_v0  ;;  %1788 = vmatprep.subr.bf16.mxu1 %v2152_v0  ;;  %v283_v29 = vsub.s32 4, %v2280_v26  ;;  %v371_v30 = vsub.s32 5, %v2280_v26  ;;  %v462_v31 = vsub.s32 6, %v2280_v26  ;;  %v552_v37 = vsub.s32 7, %v2280_v26  ;;  %s2160_s25 = smov 80   ;;  %s2161_s26 = smov 16  }
  0x37   :  { %1904 = vset.pattern.permute.xlu1 %v2154_v8  ;;  %1903 = vset.pattern.permute.xlu0 %v2155_v9  ;;  %v2292_v43 = vunpack.c.h.bf16 %v1713_v35  ;;  %v2294_v45 = vunpack.c.l.bf16 %v1713_v35  ;;  %s2162_s27 = smov 32   ;;  %s2163_s28 = smov 48  }
  0x38   :  { %s2164_s22 = smov [#allocation10]  }
  0x39   :  { %1781 = vmatpush3.bf16.msra.mxu0 %v1920_v2  ;;  %1789 = vmatpush3.bf16.msra.mxu1 %v1923_v5  ;;  %s1637_s23 = sshll.u32 %s2164_s22, 4  ;;  %s1638_s23 = int_to_ptr.vmem [resolvable:$true] %s1637_s23 }
  0x3a   :  { %1798 = vmatprep.subr.bf16.mxu0 %v2152_v0  ;;  %1790 = vmatprep.subr.bf16.mxu1 %v2152_v0  ;;  %p2123_p7 = scmp.lt.s32.totalorder %s1638_s23, %s1638_s23 }
  0x3c   :  { %1783 = vmatmul.mubr.msk.bf16.vlgmr.msra.gmra.mxu0 %vm116_vm1, %v1921_v3 }
  0x3d   :  { %1800 = vmatprep.mubr.msk.bf16.mxu0 %vm2153_vm0, %v2152_v0  ;;  %1791 = vmatpush3.bf16.msra.mxu1 %v1924_v6 }
  0x3e   :  { %1792 = vmatprep.subr.bf16.mxu1 %v2152_v0 }
  0x41   :  { %1793 = vmatpush3.bf16.msra.mxu1 %v1925_v7 }
  0xfc   :  { %v154_v10 = vpop.f32.mrf.mxu0 }
  0xfe   :  { %v1784_v11 = vpop.f32.mrf.mxu0 }
 0x100   :  { %v157_v12 = vpop.f32.mrf.mxu0 }
 0x101   :  { %v2269_v13 = vpack.c.bf16 %v157_v12, %v154_v10 }
 0x102   :  { %v1785_v14 = vpop.f32.mrf.mxu0 }
 0x103   :  { %1795 = vmatmul.mubr.msk.bf16.vlgmr.msra.gmra.mxu1 %vm194_vm2, %v2269_v13  ;;  %1799 = vmatpush3.bf16.msra.mxu0 %v2269_v13 }
 0x104   :  { %1804 = vmatprep.subr.bf16.mxu0 %v2152_v0  ;;  %766 = vmatprep.mubr.bf16.mxu1 %v2155_v9 }
 0x1c3   :  { %v232_v15 = vpop.f32.mrf.mxu1 }
 0x1c4   :  { %362 = vperm.xlu1 %1904, %v232_v15   ;;  %273 = vperm.xlu0 %1903, %v232_v15  }
 0x1c5   :  { %v1796_v16 = vpop.f32.mrf.mxu1 }
 0x1c7   :  { %v235_v17 = vpop.f32.mrf.mxu1 }
 0x1c8   :  { %1906 = vset.pattern.permute.xlu1 %v2156_v18  ;;  %1905 = vset.pattern.permute.xlu0 %v2157_v19 }
 0x1c9   :  { %543 = vperm.xlu1 %1906, %v232_v15   ;;  %453 = vperm.xlu0 %1905, %v232_v15   ;;  %v1797_v20 = vpop.f32.mrf.mxu1 }
 0x1cd   :  { %1908 = vset.pattern.permute.xlu1 %v2154_v8  ;;  %1907 = vset.pattern.permute.xlu0 %v2155_v9 }
 0x1ce   :  { %366 = vperm.xlu1 %1908, %v235_v17   ;;  %278 = vperm.xlu0 %1907, %v235_v17  }
 0x1d2   :  { %1909 = vset.pattern.permute.xlu1 %v2157_v19  ;;  %1910 = vset.pattern.permute.xlu0 %v2156_v18 }
 0x1d3   :  { %457 = vperm.xlu1 %1909, %v235_v17   ;;  %547 = vperm.xlu0 %1910, %v235_v17  }
 0x1d7   :  { %1913 = vset.pattern.permute.xlu0 %v2155_v9 }
 0x1fc   :  { %239 = vxpose.xlu1.b32.start [1/2] (short) (narrow) %v232_v15, 8 }
 0x200   :  { %240 = vxpose.xlu1.b32.end [2/2] (short) (narrow) %v235_v17, 8 }
 0x21e   :  { %1911 = vset.pattern.permute.xlu1 %v2155_v9 }
 0x23f   :  { %v363_v21 = vpop.permute.xlu1 %362  ;;  %v274_v24 = vpop.permute.xlu0 %273 }
 0x244   :  { %v544_v22 = vpop.permute.xlu1 %543  ;;  %v454_v27 = vpop.permute.xlu0 %453 }
 0x249   :  { %v367_v25 = vpop.permute.xlu1 %366  ;;  %v279_v36 = vpop.permute.xlu0 %278 }
 0x24e   :  { %v458_v28 = vpop.permute.xlu1 %457  ;;  %v548_v16 = vpop.permute.xlu0 %547 }
 0x278   :  { %v255_v32 = vpop.trf.xlu1 }
 0x279   :  { %v284_v33 = vrot.slane %v255_v32, %v283_v29  ;;  %v372_v34 = vrot.slane %v255_v32, %v371_v30  ;;  %v463_v38 = vrot.slane %v255_v32, %v462_v31  ;;  %v553_v48 = vrot.slane %v255_v32, %v552_v37 }
 0x27b   :  { %v374_v39 = vadd.f32 %v372_v34, %v367_v25  ;;  %v285_v40 = vadd.f32 %v284_v33, %v274_v24  ;;  %v373_v41 = vadd.f32 %v372_v34, %v363_v21  ;;  %v286_v42 = vadd.f32 %v284_v33, %v279_v36 }
 0x27c   :  { %v464_v49 = vadd.f32 %v463_v38, %v454_v27  ;;  %v554_v57 = vadd.f32 %v553_v48, %v544_v22  ;;  %v465_v62 = vadd.f32 %v463_v38, %v458_v28  ;;  %v555_v17 = vadd.f32 %v553_v48, %v548_v16 }
 0x27d   :  { %v376_v44 = vmul.f32 0.2, %v374_v39  ;;  %v287_v46 = vmul.f32 0.2, %v285_v40  ;;  %v375_v47 = vmul.f32 0.2, %v373_v41 }
 0x27e   :  { %v288_v53 = vmul.f32 0.2, %v286_v42  ;;  %v466_v56 = vmul.f32 0.2, %v464_v49  ;;  %v556_v3 = vmul.f32 0.2, %v554_v57 }
 0x27f   :  { %v378_v50 = vmax.f32 %v374_v39, %v376_v44  ;;  %v289_v51 = vmax.f32 %v285_v40, %v287_v46  ;;  %v377_v52 = vmax.f32 %v373_v41, %v375_v47  ;;  %v467_v7 = vmul.f32 0.2, %v465_v62 }
 0x280   :  { %v290_v61 = vmax.f32 %v286_v42, %v288_v53  ;;  %v468_v2 = vmax.f32 %v464_v49, %v466_v56  ;;  %v558_v6 = vmax.f32 %v554_v57, %v556_v3  ;;  %v557_v20 = vmul.f32 0.2, %v555_v17 }
 0x281   :  { %v380_v54 = vadd.f32 %v2292_v43, %v378_v50  ;;  %v291_v55 = vadd.f32 %v2294_v45, %v289_v51  ;;  %v379_v60 = vadd.f32 %v2294_v45, %v377_v52  ;;  %v469_v11 = vmax.f32 %v465_v62, %v467_v7 }
 0x282   :  { %v292_v1 = vadd.f32 %v2292_v43, %v290_v61  ;;  %v470_v5 = vadd.f32 %v2294_v45, %v468_v2  ;;  %v560_v10 = vadd.f32 %v2294_v45, %v558_v6  ;;  %v559_v21 = vmax.f32 %v555_v17, %v557_v20 }
 0x283   :  { %v384_v58 = vsel %vm293_vm3, %v380_v54, -inf  ;;  %v294_v59 = vsel %vm293_vm3, %v291_v55, -inf  ;;  %v381_v63 = vsel %vm293_vm3, %v379_v60, -inf  ;;  %v471_v14 = vadd.f32 %v2292_v43, %v469_v11 }
 0x284   :  { %385 = vmax.xlane.f32.xlu1 %v384_v58  ;;  %295 = vmax.xlane.f32.xlu0 %v294_v59  ;;  %v297_v4 = vsel %vm293_vm3, %v292_v1, -inf  ;;  %v472_v9 = vsel %vm293_vm3, %v470_v5, -inf  ;;  %v562_v12 = vsel %vm293_vm3, %v560_v10, -inf  ;;  %v2315_v22 = vadd.f32 %v2292_v43, %v559_v21 }
 0x285   :  { %v475_v15 = vsel %vm293_vm3, %v471_v14, -inf }
 0x286   :  { %v565_v23 = vsel %vm293_vm3, %v2315_v22, -inf }
 0x288   :  { %382 = vmax.xlane.f32.xlu0 %v381_v63 }
 0x28c   :  { %298 = vmax.xlane.f32.xlu0 %v297_v4 }
 0x290   :  { %473 = vmax.xlane.f32.xlu0 %v472_v9 }
 0x294   :  { %563 = vmax.xlane.f32.xlu0 %v562_v12 }
 0x295   :  { %493 = vrot.lane.b32.xlu1 %v2269_v13, %s2158_s7 }
 0x298   :  { %476 = vmax.xlane.f32.xlu0 %v475_v15 }
 0x2ae   :  { %403 = vrot.lane.b32.xlu0 %v2269_v13, %s2159_s24 }
 0x2cd   :  { %566 = vmax.xlane.f32.xlu0 %v565_v23 }
 0x2e3   :  { %583 = vrot.lane.b32.xlu0 %v2269_v13, %s2160_s25 }
 0x30d   :  { %v386_v24 = vpop.xlane.xlu1 %385  ;;  %v296_v25 = vpop.xlane.xlu0 %295 }
 0x30e   :  { %v388_v27 = vsub.f32 %v380_v54, %v386_v24  ;;  %v300_v32 = vsub.f32 %v291_v55, %v296_v25 }
 0x310   :  { %v391_v28 = vmul.f32 1.442695, %v388_v27  ;;  %v302_v36 = vmul.f32 1.442695, %v300_v32 }
 0x311   :  { %v383_v33 = vpop.xlane.xlu0 %382  ;;  %v494_v2 = vpop.permute.xlu1 %493 }
 0x312   :  { %1966 = vpow2.f32 %v391_v28  ;;  %v387_v34 = vsub.f32 %v379_v60, %v383_v33 }
 0x314   :  { %v389_v35 = vmul.f32 1.442695, %v387_v34 }
 0x315   :  { %v299_v38 = vpop.xlane.xlu0 %298 }
 0x316   :  { %1968 = vpow2.f32 %v389_v35  ;;  %v301_v39 = vsub.f32 %v292_v1, %v299_v38 }
 0x317   :  { %1970 = vpow2.f32 %v302_v36 }
 0x318   :  { %v304_v40 = vmul.f32 1.442695, %v301_v39 }
 0x319   :  { %v474_v41 = vpop.xlane.xlu0 %473 }
 0x31a   :  { %1972 = vpow2.f32 %v304_v40  ;;  %v478_v42 = vsub.f32 %v470_v5, %v474_v41 }
 0x31c   :  { %v480_v44 = vmul.f32 1.442695, %v478_v42 }
 0x31d   :  { %v564_v13 = vpop.xlane.xlu0 %563 }
 0x31e   :  { %1974 = vpow2.f32 %v480_v44  ;;  %v568_v46 = vsub.f32 %v560_v10, %v564_v13 }
 0x31f   :  { %v1967_v47 = vpop.eup %1966 }
 0x320   :  { %v570_v48 = vmul.f32 1.442695, %v568_v46  ;;  %v396_v49 = vsel %vm293_vm3, %v1967_v47, 0.0 }
 0x321   :  { %397 = vadd.xlane.f32.xlu1 %v396_v49  ;;  %v477_v50 = vpop.xlane.xlu0 %476 }
 0x322   :  { %1976 = vpow2.f32 %v570_v48  ;;  %v479_v51 = vsub.f32 %v471_v14, %v477_v50 }
 0x323   :  { %v1969_v52 = vpop.eup %1968 }
 0x324   :  { %v482_v53 = vmul.f32 1.442695, %v479_v51  ;;  %v393_v54 = vsel %vm293_vm3, %v1969_v52, 0.0  ;;  %v1971_v55 = vpop.eup %1970  ;;  %v401_v1 = vpack.c.bf16 %v1967_v47, %v1969_v52 }
 0x325   :  { %394 = vadd.xlane.f32.xlu0 %v393_v54  ;;  %v404_v59 = vpop.permute.xlu0 %403  ;;  %v306_v15 = vsel %vm293_vm3, %v1971_v55, 0.0 }
 0x326   :  { %1978 = vpow2.f32 %v482_v53 }
 0x327   :  { %v1973_v56 = vpop.eup %1972 }
 0x328   :  { %v309_v57 = vsel %vm293_vm3, %v1973_v56, 0.0  ;;  %v314_v58 = vpack.c.bf16 %v1973_v56, %v1971_v55 }
 0x329   :  { %310 = vadd.xlane.f32.xlu1 %v309_v57  ;;  %v1928_v57 = vld [vmem:[%s2562_s8 + $0x34] ss:$8 sps:$4 sm:$0xff]  }
 0x32a   :  { %1801 = vmatmul.mubr.msk.bf16.vlgmr.msra.gmra.mxu0 %vm293_vm3, %v314_v58  ;;  %742 = vmatprep.subr.bf16.mxu1 %v1928_v57  ;;  %v1950_v57 = vld [vmem:[%s2563_s9 + $0x48] sm:$0xff]  }
 0x32b   :  { %v1975_v60 = vpop.eup %1974  ;;  %1805 = vmatpush3.bf16.msra.mxu0 %v404_v59  ;;  %1806 = vmatprep.mubr.msk.bf16.mxu0 %vm2153_vm0, %v2152_v0  ;;  %v1926_v59 = vld [vmem:[%s2562_s8 + $0x30] ss:$8 sps:$4 sm:$0xff]  }
 0x32c   :  { %v484_v61 = vsel %vm293_vm3, %v1975_v60, 0.0  ;;  %1810 = vmatprep.subr.bf16.mxu0 %v2152_v0  ;;  %743 = vmatpush1.bf16.msra.mxu1 %v1926_v59  ;;  %v1952_v59 = vld [vmem:[%s2563_s9 + $0x40] sm:$0xff]  }
 0x32d   :  { %485 = vadd.xlane.f32.xlu0 %v484_v61  ;;  %v1929_v61 = vld [vmem:[%s2562_s8 + $0x20] ss:$8 sps:$4 sm:$0xff]  }
 0x32f   :  { %v1977_v62 = vpop.eup %1976 }
 0x330   :  { %v574_v63 = vsel %vm293_vm3, %v1977_v62, 0.0 }
 0x331   :  { %575 = vadd.xlane.f32.xlu0 %v574_v63  ;;  %v1932_v63 = vld [vmem:[%s2562_s8 + $0x10] ss:$8 sps:$4 sm:$0xff]  }
 0x332   :  { %1807 = vmatmul.mubr.msk.bf16.vlgmr.msra.gmra.mxu0 %vm293_vm3, %v401_v1  ;;  %v1937_v1 = vld [vmem:[%s2562_s8 + $0x4] ss:$8 sps:$4 sm:$0xff]  }
 0x333   :  { %v1979_v3 = vpop.eup %1978  ;;  %1811 = vmatpush3.bf16.msra.mxu0 %v494_v2  ;;  %1812 = vmatprep.mubr.msk.bf16.mxu0 %vm2153_vm0, %v2152_v0  ;;  %v1935_v2 = vld [vmem:[%s2562_s8] ss:$8 sps:$4 sm:$0xff]  }
 0x334   :  { %v487_v4 = vsel %vm293_vm3, %v1979_v3, 0.0  ;;  %1816 = vmatprep.subr.bf16.mxu0 %v2152_v0  ;;  %v492_v5 = vpack.c.bf16 %v1979_v3, %v1975_v60  ;;  %v1931_v60 = vld [vmem:[%s2562_s8 + $0x24] ss:$8 sps:$4 sm:$0xff]   ;;  %v1938_v3 = vld [vmem:[%s2563_s9 + $0x78] sm:$0xff]  }
 0x335   :  { %488 = vadd.xlane.f32.xlu0 %v487_v4  ;;  %744 = vmatprep.subr.bf16.mxu1 %v1931_v60  ;;  %v1939_v4 = vld [vmem:[%s2563_s9 + $0x38] sm:$0xff]   ;;  %v1953_v60 = vld [vmem:[%s2563_s9] sm:$0xff]  }
 0x336   :  { %745 = vmatpush1.bf16.msra.mxu1 %v1929_v61 }
 0x33a   :  { %1813 = vmatmul.mubr.msk.bf16.vlgmr.msra.gmra.mxu0 %vm293_vm3, %v492_v5  ;;  %v1940_v5 = vld [vmem:[%s2563_s9 + $0x70] sm:$0xff]  }
 0x33b   :  { %1818 = vmatprep.mubr.msk.bf16.mxu0 %vm2153_vm0, %v2152_v0 }
 0x356   :  { %v567_v6 = vpop.xlane.xlu0 %566 }
 0x357   :  { %v569_v7 = vsub.f32 %v2315_v22, %v567_v6  ;;  %v1941_v6 = vld [vmem:[%s2563_s9 + $0x30] sm:$0xff]  }
 0x359   :  { %v572_v9 = vmul.f32 1.442695, %v569_v7  ;;  %v1942_v7 = vld [vmem:[%s2563_s9 + $0x68] sm:$0xff]  }
 0x35a   :  { %v584_v10 = vpop.permute.xlu0 %583 }
 0x35b   :  { %1980 = vpow2.f32 %v572_v9  ;;  %1817 = vmatpush3.bf16.msra.mxu0 %v584_v10  ;;  %v1943_v9 = vld [vmem:[%s2563_s9 + $0x28] sm:$0xff]   ;;  %v1944_v10 = vld [vmem:[%s2563_s9 + $0x60] sm:$0xff]  }
 0x35c   :  { %1732 = vmatprep.subr.bf16.mxu0 %v1938_v3 }
 0x368   :  { %v1981_v11 = vpop.eup %1980 }
 0x369   :  { %v577_v12 = vsel %vm293_vm3, %v1981_v11, 0.0  ;;  %v582_v14 = vpack.c.bf16 %v1981_v11, %v1977_v62  ;;  %v1934_v62 = vld [vmem:[%s2562_s8 + $0x14] ss:$8 sps:$4 sm:$0xff]   ;;  %v1945_v11 = vld [vmem:[%s2563_s9 + $0x20] sm:$0xff]  }
 0x36a   :  { %578 = vadd.xlane.f32.xlu0 %v577_v12  ;;  %746 = vmatprep.subr.bf16.mxu1 %v1934_v62  ;;  %v1946_v12 = vld [vmem:[%s2563_s9 + $0x58] sm:$0xff]  }
 0x36b   :  { %1819 = vmatmul.mubr.msk.bf16.vlgmr.msra.gmra.mxu0 %vm293_vm3, %v582_v14  ;;  %747 = vmatpush1.bf16.msra.mxu1 %v1932_v63  ;;  %v1947_v14 = vld [vmem:[%s2563_s9 + $0x18] sm:$0xff]  }
 0x36c   :  { %748 = vmatprep.subr.bf16.mxu1 %v1937_v1  ;;  %1733 = vmatpush3.bf16.msra.mxu0 %v1939_v4 }
 0x36d   :  { %1734 = vmatprep.subr.bf16.mxu0 %v1940_v5 }
 0x36e   :  { %307 = vadd.xlane.f32.xlu0 %v306_v15  ;;  %v1948_v15 = vld [vmem:[%s2563_s9 + $0x50] sm:$0xff]  }
 0x36f   :  { %749 = vmatpush1.bf16.msra.mxu1 %v1935_v2 }
 0x370   :  { %1822 = vmatprep.subr.bf16.mxu1 %v2152_v0  ;;  %1735 = vmatpush3.bf16.msra.mxu0 %v1941_v6 }
 0x371   :  { %1736 = vmatprep.subr.bf16.mxu0 %v1942_v7 }
 0x374   :  { %1737 = vmatpush3.bf16.msra.mxu0 %v1943_v9 }
 0x375   :  { %1738 = vmatprep.subr.bf16.mxu0 %v1944_v10 }
 0x378   :  { %1739 = vmatpush3.bf16.msra.mxu0 %v1945_v11 }
 0x379   :  { %1740 = vmatprep.subr.bf16.mxu0 %v1946_v12 }
 0x37c   :  { %1741 = vmatpush3.bf16.msra.mxu0 %v1947_v14 }
 0x37d   :  { %1742 = vmatprep.subr.bf16.mxu0 %v1948_v15 }
 0x3aa   :  { %v398_v20 = vpop.xlane.xlu1 %397 }
 0x3ae   :  { %v395_v16 = vpop.xlane.xlu0 %394 }
 0x3af   :  { %1982 = vrcp.f32 %v395_v16  ;;  %v1949_v16 = vld [vmem:[%s2563_s9 + $0x10] sm:$0xff]  }
 0x3b0   :  { %1984 = vrcp.f32 %v398_v20  ;;  %1743 = vmatpush3.bf16.msra.mxu0 %v1949_v16 }
 0x3b1   :  { %1744 = vmatprep.subr.bf16.mxu0 %v1950_v57 }
 0x3b2   :  { %v311_v20 = vpop.xlane.xlu1 %310 }
 0x3b6   :  { %v486_v17 = vpop.xlane.xlu0 %485 }
 0x3b7   :  { %1986 = vrcp.f32 %v486_v17 }
 0x3ba   :  { %v576_v21 = vpop.xlane.xlu0 %575 }
 0x3bc   :  { %v1983_v28 = vpop.eup %1982 }
 0x3bd   :  { %v1985_v35 = vpop.eup %1984 }
 0x3be   :  { %v489_v24 = vpop.xlane.xlu0 %488 }
 0x3bf   :  { %1988 = vrcp.f32 %v489_v24 }
 0x3c0   :  { %1990 = vrcp.f32 %v576_v21 }
 0x3c4   :  { %v1987_v40 = vpop.eup %1986 }
 0x3cc   :  { %v1989_v13 = vpop.eup %1988 }
 0x3cd   :  { %v1991_v50 = vpop.eup %1990 }
 0x3ea   :  { %v2341_v22 = vpop.f32.mrf.mxu0 }
 0x3ec   :  { %v1802_v23 = vpop.f32.mrf.mxu0 }
 0x3ee   :  { %v2343_v25 = vpop.f32.mrf.mxu0 }
 0x3f0   :  { %v1803_v27 = vpop.f32.mrf.mxu0 }
 0x3f2   :  { %v443_v32 = vpop.f32.mrf.mxu0 }
 0x3f3   :  { %v450_v33 = vmul.f32 %v1983_v28, %v443_v32  ;;  %v579_v49 = vpop.xlane.xlu0 %578 }
 0x3f4   :  { %v1808_v34 = vpop.f32.mrf.mxu0  ;;  %1992 = vrcp.f32 %v579_v49 }
 0x3f5   :  { %634 = vrot.lane.b32.xlu0 %v450_v33, %s2161_s26  ;;  %v1661_v33 = vld [vmem:[#allocation8 + $0x4] ss:$0 sm:$0xff] }
 0x3f6   :  { %v446_v36 = vpop.f32.mrf.mxu0 }
 0x3f7   :  { %v451_v38 = vmul.f32 %v1985_v35, %v446_v36  ;;  %v308_v17 = vpop.xlane.xlu0 %307 }
 0x3f8   :  { %v1809_v39 = vpop.f32.mrf.mxu0  ;;  %1994 = vrcp.f32 %v308_v17 }
 0x3f9   :  { %636 = vrot.lane.b32.xlu1 %v451_v38, %s2161_s26  ;;  %1996 = vrcp.f32 %v311_v20 }
 0x3fa   :  { %v533_v41 = vpop.f32.mrf.mxu0 }
 0x3fb   :  { %v540_v42 = vmul.f32 %v1987_v40, %v533_v41 }
 0x3fc   :  { %v1814_v44 = vpop.f32.mrf.mxu0 }
 0x3fd   :  { %642 = vrot.lane.b32.xlu1 %v540_v42, %s2162_s27 }
 0x3fe   :  { %v536_v46 = vpop.f32.mrf.mxu0 }
 0x3ff   :  { %v541_v47 = vmul.f32 %v1989_v13, %v536_v46 }
 0x400   :  { %v1815_v48 = vpop.f32.mrf.mxu0 }
 0x401   :  { %644 = vrot.lane.b32.xlu0 %v541_v47, %s2162_s27  ;;  %v1993_v54 = vpop.eup %1992 }
 0x405   :  { %v1995_v23 = vpop.eup %1994 }
 0x406   :  { %v359_v28 = vmul.f32 %v1995_v23, %v2341_v22  ;;  %v1997_v34 = vpop.eup %1996 }
 0x407   :  { %v360_v39 = vmul.f32 %v1997_v34, %v2343_v25 }
 0x42b   :  { %v623_v51 = vpop.f32.mrf.mxu0 }
 0x42c   :  { %v630_v52 = vmul.f32 %v1991_v50, %v623_v51 }
 0x42d   :  { %v1820_v53 = vpop.f32.mrf.mxu0 }
 0x42e   :  { %650 = vrot.lane.b32.xlu1 %v630_v52, %s2163_s28 }
 0x42f   :  { %v626_v55 = vpop.f32.mrf.mxu0 }
 0x430   :  { %v631_v56 = vmul.f32 %v1993_v54, %v626_v55 }
 0x431   :  { %v1821_v58 = vpop.f32.mrf.mxu0 }
 0x432   :  { %652 = vrot.lane.b32.xlu0 %v631_v56, %s2163_s28  ;;  %v1951_v58 = vld [vmem:[%s2563_s9 + $0x8] sm:$0xff]  }
 0x433   :  { %1745 = vmatpush3.bf16.msra.mxu0 %v1951_v58 }
 0x434   :  { %1746 = vmatprep.subr.bf16.mxu0 %v1952_v59 }
 0x437   :  { %1747 = vmatpush3.bf16.msra.mxu0 %v1953_v60 }
 0x438   :  { %1840 = vmatprep.subr.bf16.mxu0 %v2152_v0 }
 0x467   :  { %v635_v24 = vpop.permute.xlu0 %634 }
 0x468   :  { %v656_v32 = vsel %vm293_vm3, %v359_v28, %v635_v24 }
 0x46b   :  { %v637_v21 = vpop.permute.xlu1 %636 }
 0x46c   :  { %v657_v42 = vsel %vm293_vm3, %v360_v39, %v637_v21 }
 0x46f   :  { %v643_v27 = vpop.permute.xlu1 %642 }
 0x470   :  { %v658_v35 = vsel %vm116_vm1, %v656_v32, %v643_v27 }
 0x473   :  { %v645_v36 = vpop.permute.xlu0 %644 }
 0x474   :  { %v659_v44 = vsel %vm116_vm1, %v657_v42, %v645_v36 }
 0x4a0   :  { %v651_v38 = vpop.permute.xlu1 %650 }
 0x4a1   :  { %v661_v40 = vsel %vm660_vm4, %v658_v35, %v651_v38 }
 0x4a2   :  { %v667_v41 = vadd.f32 %v1661_v33, %v661_v40 }
 0x4a4   :  { %v671_v13 = vmin.f32 %v667_v41, 0.0  ;;  %v653_v46 = vpop.permute.xlu0 %652  ;;  %vm669_vm5 = vcmp.gt.f32.partialorder %v667_v41, 0.0 }
 0x4a5   :  { %v662_v22 = vsel %vm660_vm4, %v659_v44, %v653_v46 }
 0x4a6   :  { %v673_v47 = vmul.f32 1.442695, %v671_v13  ;;  %v668_v48 = vadd.f32 %v1661_v33, %v662_v22 }
 0x4a8   :  { %1998 = vpow2.f32 %v673_v47  ;;  %v672_v49 = vmin.f32 %v668_v48, 0.0  ;;  %vm670_vm6 = vcmp.gt.f32.partialorder %v668_v48, 0.0 }
 0x4aa   :  { %v675_v50 = vmul.f32 1.442695, %v672_v49 }
 0x4ac   :  { %2000 = vpow2.f32 %v675_v50 }
 0x4b5   :  { %v1999_v51 = vpop.eup %1998 }
 0x4b6   :  { %v1662_v52 = vadd.f32 -1.0, %v1999_v51 }
 0x4b8   :  { %v679_v25 = vsel %vm669_vm5, %v667_v41, %v1662_v52 }
 0x4b9   :  { %v2001_v53 = vpop.eup %2000 }
 0x4ba   :  { %v1663_v54 = vadd.f32 -1.0, %v2001_v53 }
 0x4bc   :  { %v680_v55 = vsel %vm670_vm6, %v668_v48, %v1663_v54 }
 0x4bd   :  { %v681_v56 = vpack.c.bf16 %v680_v55, %v679_v25 }
 0x4bf   :  { %1672 = vmatmul.mubr.msk.bf16.vlgmr.msra.gmra.mxu1 %vm194_vm2, %v681_v56 }
 0x4c0   :  { %1824 = vmatprep.mubr.msk.bf16.mxu1 %vm2153_vm0, %v2152_v0 }
 0x57f   :  { %v768_v61 = vpop.f32.mrf.mxu1 }
 0x581   :  { %v770_v62 = vpop.f32.mrf.mxu1 }
 0x583   :  { %v772_v63 = vpop.f32.mrf.mxu1 }
 0x584   :  { %v2428_v1 = vpack.c.bf16 %v772_v63, %v768_v61 }
 0x585   :  { %v774_v2 = vpop.f32.mrf.mxu1 }
 0x586   :  { %v2430_v3 = vpack.c.bf16 %v774_v2, %v770_v62  ;;  %1823 = vmatpush3.bf16.msra.mxu1 %v2428_v1 }
 0x587   :  { %1828 = vmatprep.subr.bf16.mxu1 %v2152_v0 }
 0x588   :  { %939 = vmatprep.mubr.bf16.mxu0 %v2430_v3 }
 0x589   :  { %940 = vmatmul.mubr.bf16.vlgmr.msra.gmra.mxu0 %v2428_v1 }
 0x58a   :  { %1842 = vmatprep.mubr.msk.bf16.mxu0 %vm2153_vm0, %v2152_v0 }
 0x649   :  { %v1748_v4 = vpop.f32.mrf.mxu0 }
 0x64b   :  { %v1749_v5 = vpop.f32.mrf.mxu0 }
 0x64c   :  { %v1750_v6 = vadd.f32 %v1749_v5, %v1748_v4 }
 0x64d   :  { %v1751_v7 = vpop.f32.mrf.mxu0 }
 0x64e   :  { %982 = vperm.xlu1 %1911, %v1750_v6  }
 0x64f   :  { %v1752_v9 = vpop.f32.mrf.mxu0 }
 0x650   :  { %v1753_v10 = vadd.f32 %v1752_v9, %v1751_v7 }
 0x652   :  { %987 = vperm.xlu0 %1913, %v1753_v10   ;;  %1912 = vset.pattern.permute.xlu1 %v2154_v8 }
 0x653   :  { %1070 = vperm.xlu1 %1912, %v1750_v6  }
 0x656   :  { %1914 = vset.pattern.permute.xlu0 %v2157_v19 }
 0x657   :  { %1163 = vperm.xlu0 %1914, %v1750_v6   ;;  %1915 = vset.pattern.permute.xlu1 %v2156_v18 }
 0x658   :  { %1252 = vperm.xlu1 %1915, %v1750_v6  }
 0x65b   :  { %1918 = vset.pattern.permute.xlu0 %v2156_v18 }
 0x65c   :  { %1256 = vperm.xlu0 %1918, %v1753_v10   ;;  %1916 = vset.pattern.permute.xlu1 %v2154_v8 }
 0x65d   :  { %1074 = vperm.xlu1 %1916, %v1753_v10  }
 0x661   :  { %1917 = vset.pattern.permute.xlu1 %v2157_v19 }
 0x662   :  { %1167 = vperm.xlu1 %1917, %v1753_v10  }
 0x68b   :  { %948 = vxpose.xlu1.b32.start [1/2] (short) (narrow) %v1750_v6, 8 }
 0x68f   :  { %949 = vxpose.xlu1.b32.end [2/2] (short) (narrow) %v1753_v10, 8 }
 0x6c9   :  { %v983_v11 = vpop.permute.xlu1 %982 }
 0x6cd   :  { %v988_v17 = vpop.permute.xlu0 %987 }
 0x6ce   :  { %v1071_v12 = vpop.permute.xlu1 %1070 }
 0x6d2   :  { %v1164_v28 = vpop.permute.xlu0 %1163 }
 0x6d3   :  { %v1253_v14 = vpop.permute.xlu1 %1252 }
 0x6d7   :  { %v1257_v50 = vpop.permute.xlu0 %1256 }
 0x6d8   :  { %v1075_v15 = vpop.permute.xlu1 %1074 }
 0x6dd   :  { %v1168_v16 = vpop.permute.xlu1 %1167 }
 0x707   :  { %v964_v20 = vpop.trf.xlu1 }
 0x708   :  { %v993_v21 = vrot.slane %v964_v20, %v283_v29  ;;  %v1080_v18 = vrot.slane %v964_v20, %v371_v30  ;;  %v1173_v8 = vrot.slane %v964_v20, %v462_v31  ;;  %v1262_v35 = vrot.slane %v964_v20, %v552_v37 }
 0x70a   :  { %v1082_v19 = vadd.f32 %v1080_v18, %v1075_v15  ;;  %v994_v23 = vadd.f32 %v993_v21, %v983_v11  ;;  %v1081_v24 = vadd.f32 %v1080_v18, %v1071_v12  ;;  %v995_v27 = vadd.f32 %v993_v21, %v988_v17 }
 0x70b   :  { %v1174_v36 = vadd.f32 %v1173_v8, %v1164_v28  ;;  %v1263_v42 = vadd.f32 %v1262_v35, %v1253_v14  ;;  %v1175_v26 = vadd.f32 %v1173_v8, %v1168_v16  ;;  %v1264_v51 = vadd.f32 %v1262_v35, %v1257_v50 }
 0x70c   :  { %v1084_v32 = vmul.f32 0.2, %v1082_v19  ;;  %v996_v33 = vmul.f32 0.2, %v994_v23  ;;  %v1083_v34 = vmul.f32 0.2, %v1081_v24 }
 0x70d   :  { %v997_v40 = vmul.f32 0.2, %v995_v27  ;;  %v1176_v41 = vmul.f32 0.2, %v1174_v36  ;;  %v1265_v49 = vmul.f32 0.2, %v1263_v42 }
 0x70e   :  { %v1086_v38 = vmax.f32 %v1082_v19, %v1084_v32  ;;  %v998_v29 = vmax.f32 %v994_v23, %v996_v33  ;;  %v1085_v39 = vmax.f32 %v1081_v24, %v1083_v34  ;;  %v1177_v25 = vmul.f32 0.2, %v1175_v26 }
 0x70f   :  { %v999_v22 = vmax.f32 %v995_v27, %v997_v40  ;;  %v1178_v48 = vmax.f32 %v1174_v36, %v1176_v41  ;;  %v1267_v54 = vmax.f32 %v1263_v42, %v1265_v49  ;;  %v1266_v58 = vmul.f32 0.2, %v1264_v51 }
 0x710   :  { %v1088_v30 = vadd.f32 %v2292_v43, %v1086_v38  ;;  %v1000_v31 = vadd.f32 %v2294_v45, %v998_v29  ;;  %v1087_v46 = vadd.f32 %v2294_v45, %v1085_v39  ;;  %v1179_v57 = vmax.f32 %v1175_v26, %v1177_v25 }
 0x711   :  { %v1001_v47 = vadd.f32 %v2292_v43, %v999_v22  ;;  %v1180_v53 = vadd.f32 %v2294_v45, %v1178_v48  ;;  %v1269_v56 = vadd.f32 %v2294_v45, %v1267_v54  ;;  %v1268_v61 = vmax.f32 %v1264_v51, %v1266_v58 }
 0x712   :  { %v1092_v44 = vsel %vm293_vm3, %v1088_v30, -inf  ;;  %v1002_v13 = vsel %vm293_vm3, %v1000_v31, -inf  ;;  %v1089_v37 = vsel %vm293_vm3, %v1087_v46, -inf  ;;  %v1181_v60 = vadd.f32 %v2292_v43, %v1179_v57 }
 0x713   :  { %1093 = vmax.xlane.f32.xlu1 %v1092_v44  ;;  %1003 = vmax.xlane.f32.xlu0 %v1002_v13  ;;  %v1005_v52 = vsel %vm293_vm3, %v1001_v47, -inf  ;;  %v1182_v55 = vsel %vm293_vm3, %v1180_v53, -inf  ;;  %v1271_v59 = vsel %vm293_vm3, %v1269_v56, -inf  ;;  %v1270_v63 = vadd.f32 %v2292_v43, %v1268_v61 }
 0x714   :  { %v1185_v62 = vsel %vm293_vm3, %v1181_v60, -inf }
 0x715   :  { %v1274_v2 = vsel %vm293_vm3, %v1270_v63, -inf }
 0x717   :  { %1090 = vmax.xlane.f32.xlu0 %v1089_v37 }
 0x71b   :  { %1006 = vmax.xlane.f32.xlu0 %v1005_v52 }
 0x71f   :  { %1183 = vmax.xlane.f32.xlu0 %v1182_v55 }
 0x723   :  { %1272 = vmax.xlane.f32.xlu0 %v1271_v59 }
 0x724   :  { %1293 = vrot.lane.b32.xlu1 %v2430_v3, %s2148_s18 }
 0x727   :  { %1186 = vmax.xlane.f32.xlu0 %v1185_v62 }
 0x72b   :  { %1275 = vmax.xlane.f32.xlu0 %v1274_v2 }
 0x741   :  { %1111 = vrot.lane.b32.xlu0 %v2428_v1, %s2148_s18 }
 0x79c   :  { %v1094_v45 = vpop.xlane.xlu1 %1093  ;;  %v1004_v4 = vpop.xlane.xlu0 %1003 }
 0x79d   :  { %v1008_v5 = vsub.f32 %v1000_v31, %v1004_v4  ;;  %v1096_v15 = vsub.f32 %v1088_v30, %v1094_v45 }
 0x79f   :  { %v1010_v6 = vmul.f32 1.442695, %v1008_v5  ;;  %v1099_v20 = vmul.f32 1.442695, %v1096_v15 }
 0x7a0   :  { %v1294_v7 = vpop.permute.xlu1 %1293  ;;  %v1091_v9 = vpop.xlane.xlu0 %1090 }
 0x7a1   :  { %v1095_v10 = vsub.f32 %v1087_v46, %v1091_v9  ;;  %1841 = vmatpush3.bf16.msra.mxu0 %v1294_v7  ;;  %2002 = vpow2.f32 %v1010_v6 }
 0x7a2   :  { %1852 = vmatprep.subr.bf16.mxu0 %v2152_v0 }
 0x7a3   :  { %v1097_v11 = vmul.f32 1.442695, %v1095_v10 }
 0x7a4   :  { %v1007_v43 = vpop.xlane.xlu0 %1006 }
 0x7a5   :  { %2004 = vpow2.f32 %v1097_v11  ;;  %v1009_v12 = vsub.f32 %v1001_v47, %v1007_v43 }
 0x7a7   :  { %v1012_v14 = vmul.f32 1.442695, %v1009_v12 }
 0x7a8   :  { %v1184_v16 = vpop.xlane.xlu0 %1183 }
 0x7a9   :  { %2006 = vpow2.f32 %v1012_v14  ;;  %v1188_v1 = vsub.f32 %v1180_v53, %v1184_v16 }
 0x7ab   :  { %v1190_v17 = vmul.f32 1.442695, %v1188_v1 }
 0x7ac   :  { %v1273_v21 = vpop.xlane.xlu0 %1272 }
 0x7ad   :  { %2008 = vpow2.f32 %v1190_v17  ;;  %v1277_v18 = vsub.f32 %v1269_v56, %v1273_v21 }
 0x7ae   :  { %v2003_v8 = vpop.eup %2002  ;;  %2010 = vpow2.f32 %v1099_v20 }
 0x7af   :  { %v1279_v19 = vmul.f32 1.442695, %v1277_v18  ;;  %v1014_v23 = vsel %vm293_vm3, %v2003_v8, 0.0 }
 0x7b0   :  { %v1187_v24 = vpop.xlane.xlu0 %1186  ;;  %1015 = vadd.xlane.f32.xlu0 %v1014_v23 }
 0x7b1   :  { %2012 = vpow2.f32 %v1279_v19  ;;  %v1189_v27 = vsub.f32 %v1181_v60, %v1187_v24 }
 0x7b2   :  { %v2005_v28 = vpop.eup %2004 }
 0x7b3   :  { %v1192_v32 = vmul.f32 1.442695, %v1189_v27  ;;  %v1101_v33 = vsel %vm293_vm3, %v2005_v28, 0.0 }
 0x7b4   :  { %v1276_v34 = vpop.xlane.xlu0 %1275  ;;  %1102 = vadd.xlane.f32.xlu0 %v1101_v33 }
 0x7b5   :  { %v1278_v35 = vsub.f32 %v1270_v63, %v1276_v34  ;;  %2014 = vpow2.f32 %v1192_v32  ;;  %v1693_v34 = vld [vmem:[#allocation8 + $0x5] ss:$0 sm:$0xff] }
 0x7b6   :  { %v2007_v36 = vpop.eup %2006 }
 0x7b7   :  { %v1281_v38 = vmul.f32 1.442695, %v1278_v35  ;;  %v1017_v29 = vsel %vm293_vm3, %v2007_v36, 0.0  ;;  %v1022_v39 = vpack.c.bf16 %v2007_v36, %v2003_v8 }
 0x7b8   :  { %1018 = vadd.xlane.f32.xlu1 %v1017_v29  ;;  %v1112_v40 = vpop.permute.xlu0 %1111 }
 0x7b9   :  { %2016 = vpow2.f32 %v1281_v38  ;;  %1825 = vmatmul.mubr.msk.bf16.vlgmr.msra.gmra.mxu1 %vm293_vm3, %v1022_v39 }
 0x7ba   :  { %v2009_v30 = vpop.eup %2008  ;;  %1829 = vmatpush3.bf16.msra.mxu1 %v1112_v40  ;;  %1830 = vmatprep.mubr.msk.bf16.mxu1 %vm2153_vm0, %v2152_v0 }
 0x7bb   :  { %v1194_v31 = vsel %vm293_vm3, %v2009_v30, 0.0  ;;  %1834 = vmatprep.subr.bf16.mxu1 %v2152_v0  ;;  %v2011_v41 = vpop.eup %2010 }
 0x7bc   :  { %1195 = vadd.xlane.f32.xlu0 %v1194_v31  ;;  %v1109_v13 = vpack.c.bf16 %v2011_v41, %v2005_v28  ;;  %v1104_v46 = vsel %vm293_vm3, %v2011_v41, 0.0 }
 0x7be   :  { %v2013_v42 = vpop.eup %2012 }
 0x7bf   :  { %v1283_v44 = vsel %vm293_vm3, %v2013_v42, 0.0 }
 0x7c0   :  { %1284 = vadd.xlane.f32.xlu0 %v1283_v44 }
 0x7c1   :  { %1831 = vmatmul.mubr.msk.bf16.vlgmr.msra.gmra.mxu1 %vm293_vm3, %v1109_v13 }
 0x7c2   :  { %1835 = vmatpush3.bf16.msra.mxu1 %v2430_v3  ;;  %1836 = vmatprep.mubr.msk.bf16.mxu1 %vm2153_vm0, %v2152_v0  ;;  %v2015_v22 = vpop.eup %2014 }
 0x7c3   :  { %1846 = vmatprep.subr.bf16.mxu1 %v2152_v0  ;;  %v1197_v37 = vsel %vm293_vm3, %v2015_v22, 0.0  ;;  %v1202_v47 = vpack.c.bf16 %v2015_v22, %v2009_v30 }
 0x7c4   :  { %1105 = vadd.xlane.f32.xlu0 %v1104_v46 }
 0x7c6   :  { %v2017_v26 = vpop.eup %2016 }
 0x7c7   :  { %v1291_v48 = vpack.c.bf16 %v2017_v26, %v2013_v42  ;;  %v1286_v3 = vsel %vm293_vm3, %v2017_v26, 0.0 }
 0x7c8   :  { %1198 = vadd.xlane.f32.xlu0 %v1197_v37 }
 0x7c9   :  { %1837 = vmatmul.mubr.msk.bf16.vlgmr.msra.gmra.mxu1 %vm293_vm3, %v1202_v47  ;;  %1843 = vmatmul.mubr.msk.bf16.vlgmr.msra.gmra.mxu0 %vm293_vm3, %v1291_v48 }
 0x7ca   :  { %1848 = vmatprep.mubr.msk.bf16.mxu1 %vm2153_vm0, %v2152_v0  ;;  %1860 = vmatprep.mubr.msk.bf16.mxu0 %vm2153_vm0, %v2152_v0 }
 0x7cc   :  { %1287 = vadd.xlane.f32.xlu0 %v1286_v3 }
 0x839   :  { %v1016_v49 = vpop.xlane.xlu0 %1015 }
 0x83d   :  { %v1103_v50 = vpop.xlane.xlu0 %1102 }
 0x83e   :  { %2018 = vrcp.f32 %v1103_v50  ;;  %v1955_v50 = vld [vmem:[%s2558_s4 + $0x10] sm:$0xff]  }
 0x83f   :  { %2020 = vrcp.f32 %v1016_v49  ;;  %v1954_v49 = vld [vmem:[%s2558_s4 + $0x18] sm:$0xff]  }
 0x840   :  { %1853 = vmatpush3.bf16.msra.mxu0 %v1954_v49 }
 0x841   :  { %v1019_v55 = vpop.xlane.xlu1 %1018  ;;  %1854 = vmatprep.subr.bf16.mxu0 %v2152_v0 }
 0x844   :  { %1855 = vmatpush3.bf16.msra.mxu0 %v1955_v50 }
 0x845   :  { %v1196_v51 = vpop.xlane.xlu0 %1195  ;;  %1856 = vmatprep.subr.bf16.mxu0 %v2152_v0 }
 0x846   :  { %2022 = vrcp.f32 %v1196_v51  ;;  %v1956_v51 = vld [vmem:[%s2558_s4 + $0x8] sm:$0xff]  }
 0x848   :  { %1857 = vmatpush3.bf16.msra.mxu0 %v1956_v51 }
 0x849   :  { %v1285_v52 = vpop.xlane.xlu0 %1284  ;;  %1858 = vmatprep.subr.bf16.mxu0 %v2152_v0 }
 0x84b   :  { %v2019_v62 = vpop.eup %2018 }
 0x84c   :  { %v2021_v45 = vpop.eup %2020 }
 0x84d   :  { %v1106_v53 = vpop.xlane.xlu0 %1105 }
 0x84e   :  { %2024 = vrcp.f32 %v1106_v53 }
 0x84f   :  { %2026 = vrcp.f32 %v1019_v55 }
 0x850   :  { %2028 = vrcp.f32 %v1285_v52 }
 0x851   :  { %v1199_v54 = vpop.xlane.xlu0 %1198 }
 0x852   :  { %2030 = vrcp.f32 %v1199_v54 }
 0x853   :  { %v2023_v5 = vpop.eup %2022 }
 0x855   :  { %v1288_v58 = vpop.xlane.xlu0 %1287 }
 0x856   :  { %2032 = vrcp.f32 %v1288_v58 }
 0x85b   :  { %v2025_v7 = vpop.eup %2024 }
 0x85c   :  { %v2027_v11 = vpop.eup %2026 }
 0x85d   :  { %v2029_v15 = vpop.eup %2028 }
 0x85f   :  { %v2031_v18 = vpop.eup %2030 }
 0x863   :  { %v2033_v28 = vpop.eup %2032 }
 0x879   :  { %v1060_v25 = vpop.f32.mrf.mxu1 }
 0x87a   :  { %v1067_v6 = vmul.f32 %v2021_v45, %v1060_v25 }
 0x87b   :  { %v1826_v56 = vpop.f32.mrf.mxu1 }
 0x87d   :  { %v1063_v57 = vpop.f32.mrf.mxu1 }
 0x87e   :  { %v1068_v17 = vmul.f32 %v2027_v11, %v1063_v57  ;;  %v1960_v11 = vld [vmem:[%s2559_s5 + $0x28] sm:$0xff]  }
 0x87f   :  { %v1827_v59 = vpop.f32.mrf.mxu1 }
 0x880   :  { %v1694_v59 = vld [vmem:[#allocation8] ss:$0 sm:$0xff] }
 0x881   :  { %v1151_v60 = vpop.f32.mrf.mxu1 }
 0x882   :  { %v1158_v2 = vmul.f32 %v2019_v62, %v1151_v60 }
 0x883   :  { %v1832_v61 = vpop.f32.mrf.mxu1 }
 0x884   :  { %v1160_v43 = vadd.f32 %v1158_v2, %v1067_v6  ;;  %v1393_v6 = vld [vmem:[#allocation7] sm:$0x1] }
 0x885   :  { %v1154_v63 = vpop.f32.mrf.mxu1 }
 0x886   :  { %v1159_v12 = vmul.f32 %v2025_v7, %v1154_v63  ;;  %v1695_v63 = vld [vmem:[#allocation8 + $0x1] ss:$0 sm:$0xff]  ;;  %v1957_v7 = vld [vmem:[%s2558_s4] sm:$0xff]  }
 0x887   :  { %v1833_v4 = vpop.f32.mrf.mxu1  ;;  %1859 = vmatpush3.bf16.msra.mxu0 %v1957_v7 }
 0x888   :  { %v1161_v23 = vadd.f32 %v1159_v12, %v1068_v17  ;;  %v1962_v12 = vld [vmem:[%s2559_s5 + $0x18] sm:$0xff]  }
 0x889   :  { %v1240_v9 = vpop.f32.mrf.mxu1  ;;  %v1333_v10 = vpop.f32.mrf.mxu0 }
 0x88a   :  { %v1247_v14 = vmul.f32 %v2023_v5, %v1240_v9  ;;  %v1340_v21 = vmul.f32 %v2029_v15, %v1333_v10  ;;  %v1958_v9 = vld [vmem:[%s2559_s5 + $0x38] sm:$0xff]   ;;  %v1959_v10 = vld [vmem:[%s2559_s5 + $0x30] sm:$0xff]  }
 0x88b   :  { %v1838_v16 = vpop.f32.mrf.mxu1  ;;  %v1844_v1 = vpop.f32.mrf.mxu0 }
 0x88c   :  { %v1249_v20 = vadd.f32 %v1247_v14, %v1160_v43  ;;  %v1961_v43 = vld [vmem:[%s2559_s5 + $0x20] sm:$0xff]   ;;  %v1963_v14 = vld [vmem:[%s2559_s5 + $0x10] sm:$0xff]  }
 0x88d   :  { %v1243_v8 = vpop.f32.mrf.mxu1  ;;  %v1336_v19 = vpop.f32.mrf.mxu0 }
 0x88e   :  { %v1342_v24 = vadd.f32 %v1340_v21, %v1249_v20  ;;  %v1248_v27 = vmul.f32 %v2031_v18, %v1243_v8  ;;  %v1341_v38 = vmul.f32 %v2033_v28, %v1336_v19  ;;  %v1964_v21 = vld [vmem:[%s2559_s5 + $0x8] sm:$0xff]   ;;  %v1965_v18 = vld [vmem:[%s2559_s5] sm:$0xff]   ;;  %v1697_v8 = vld [vmem:[#allocation8 + $0x2] ss:$0 sm:$0xff]  ;;  %s2118_s5 = scalar_lea.vmem %s1638_s23, 32 }
 0x88f   :  { %v1839_v32 = vpop.f32.mrf.mxu1  ;;  %v1845_v33 = vpop.f32.mrf.mxu0  ;;  %p2119_p6 = scmp.ne.s32.totalorder %s1638_s23, %s2118_s5  ;;  %p2124_p8 = scmp.lt.s32.totalorder %s2118_s5, %s2118_s5 }
 0x890   :  { %v1344_v35 = vmul.f32 0.25, %v1342_v24  ;;  %v1250_v36 = vadd.f32 %v1248_v27, %v1161_v23 }
 0x891   :  { %p2125_p9 = por %p2124_p8, %p2123_p7 }
 0x892   :  { %v1343_v29 = vadd.f32 %v1341_v38, %v1250_v36  ;;  %v1350_v39 = vadd.f32 %v1693_v34, %v1344_v35 }
 0x893   :  { %p2126_p10 = pnand %p2125_p9, %p2119_p6 }
 0x894   :  { %v1345_v40 = vmul.f32 0.25, %v1343_v29  ;;  %v1354_v30 = vsel %vm194_vm2, %v1350_v39, 0.0 }
 0x895   :  { %1355 = vadd.xlane.f32.xlu1 %v1354_v30 }
 0x896   :  { %v1351_v31 = vadd.f32 %v1693_v34, %v1345_v40  ;;  %v1703_v34 = vld [vmem:[#allocation8 + $0x3] ss:$0 sm:$0xff] }
 0x898   :  { %v1357_v41 = vsel %vm194_vm2, %v1351_v31, 0.0 }
 0x899   :  { %1358 = vadd.xlane.f32.xlu0 %v1357_v41 }
 0x91e   :  { %v1356_v42 = vpop.xlane.xlu1 %1355 }
 0x91f   :  { %v1361_v44 = vmul.f32 0.015625, %v1356_v42 }
 0x921   :  { %v1363_v13 = vsub.f32 %v1350_v39, %v1361_v44 }
 0x922   :  { %v1359_v46 = vpop.xlane.xlu0 %1358 }
 0x923   :  { %v1362_v22 = vmul.f32 0.015625, %v1359_v46  ;;  %v1365_v26 = vmul.f32 %v1363_v13, %v1363_v13 }
 0x925   :  { %v1364_v37 = vsub.f32 %v1351_v31, %v1362_v22  ;;  %v1367_v47 = vsel %vm194_vm2, %v1365_v26, 0.0 }
 0x926   :  { %1368 = vadd.xlane.f32.xlu1 %v1367_v47 }
 0x927   :  { %v1366_v48 = vmul.f32 %v1364_v37, %v1364_v37 }
 0x929   :  { %v1370_v3 = vsel %vm194_vm2, %v1366_v48, 0.0 }
 0x92a   :  { %1371 = vadd.xlane.f32.xlu0 %v1370_v3 }
 0x9af   :  { %v1369_v52 = vpop.xlane.xlu1 %1368 }
 0x9b0   :  { %v1373_v53 = vmul.f32 0.015625, %v1369_v52 }
 0x9b2   :  { %v1375_v54 = vadd.f32 1e-05, %v1373_v53 }
 0x9b3   :  { %v1372_v25 = vpop.xlane.xlu0 %1371 }
 0x9b4   :  { %2034 = vrsqrt.f32 %v1375_v54  ;;  %v1374_v55 = vmul.f32 0.015625, %v1372_v25 }
 0x9b6   :  { %v1376_v56 = vadd.f32 1e-05, %v1374_v55 }
 0x9b8   :  { %2036 = vrsqrt.f32 %v1376_v56 }
 0x9c1   :  { %v2035_v57 = vpop.eup %2034 }
 0x9c2   :  { %v1379_v58 = vmul.f32 %v2035_v57, %v1363_v13 }
 0x9c4   :  { %v1385_v62 = vmul.f32 %v1694_v59, %v1379_v58 }
 0x9c5   :  { %v2037_v60 = vpop.eup %2036 }
 0x9c6   :  { %v1380_v61 = vmul.f32 %v2037_v60, %v1364_v37  ;;  %v1391_v45 = vadd.f32 %v1695_v63, %v1385_v62 }
 0x9c8   :  { %v1386_v2 = vmul.f32 %v1694_v59, %v1380_v61 }
 0x9ca   :  { %v1392_v4 = vadd.f32 %v1695_v63, %v1386_v2 }
 0x9cc   :  { %v1394_v5 = vpack.c.bf16 %v1392_v4, %v1391_v45 }
 0x9ce   :  { %1847 = vmatpush3.bf16.msra.mxu1 %v1394_v5 }
 0x9cf   :  { %1864 = vmatprep.subr.bf16.mxu1 %v2152_v0 }
 0x9d1   :  { %1849 = vmatmul.mubr.msk.bf16.vlgmr.msra.gmra.mxu1 %vm293_vm3, %v1393_v6 }
 0x9d2   :  { %1880 = vmatprep.mubr.msk.bf16.mxu1 %vm2153_vm0, %v2152_v0  ;;  %1865 = vmatpush3.bf16.msra.mxu1 %v1958_v9 }
 0x9d3   :  { %1866 = vmatprep.subr.bf16.mxu1 %v2152_v0 }
 0x9d6   :  { %1867 = vmatpush3.bf16.msra.mxu1 %v1959_v10 }
 0x9d7   :  { %1868 = vmatprep.subr.bf16.mxu1 %v2152_v0 }
 0x9da   :  { %1869 = vmatpush3.bf16.msra.mxu1 %v1960_v11 }
 0x9db   :  { %1870 = vmatprep.subr.bf16.mxu1 %v2152_v0 }
 0x9de   :  { %1871 = vmatpush3.bf16.msra.mxu1 %v1961_v43 }
 0x9df   :  { %1872 = vmatprep.subr.bf16.mxu1 %v2152_v0 }
 0x9e2   :  { %1873 = vmatpush3.bf16.msra.mxu1 %v1962_v12 }
 0x9e3   :  { %1874 = vmatprep.subr.bf16.mxu1 %v2152_v0 }
 0x9e6   :  { %1875 = vmatpush3.bf16.msra.mxu1 %v1963_v14 }
 0x9e7   :  { %1876 = vmatprep.subr.bf16.mxu1 %v2152_v0 }
 0x9ea   :  { %1877 = vmatpush3.bf16.msra.mxu1 %v1964_v21 }
 0x9eb   :  { %1878 = vmatprep.subr.bf16.mxu1 %v2152_v0 }
 0x9ee   :  { %1879 = vmatpush3.bf16.msra.mxu1 %v1965_v18 }
 0xa91   :  { %v1432_v15 = vpop.f32.mrf.mxu1 }
 0xa92   :  { %v1439_v16 = vpack.c.bf16 %v1432_v15, %v1432_v15 }
 0xa93   :  { %v1850_v1 = vpop.f32.mrf.mxu1 }
 0xa94   :  { %1861 = vmatmul.mubr.msk.bf16.vlgmr.msra.gmra.mxu0 %vm194_vm2, %v1439_v16 }
 0xa95   :  { %v1435_v17 = vpop.f32.mrf.mxu1 }
 0xa97   :  { %v1851_v20 = vpop.f32.mrf.mxu1 }
 0xb54   :  { %v1513_v19 = vpop.f32.mrf.mxu0 }
 0xb55   :  { %v1514_v23 = vadd.f32 %v1697_v8, %v1513_v19 }
 0xb56   :  { %v1862_v24 = vpop.f32.mrf.mxu0 }
 0xb57   :  { %v1519_v27 = vmax.f32 %v1514_v23, 0.0 }
 0xb58   :  { %v1516_v28 = vpop.f32.mrf.mxu0 }
 0xb59   :  { %v1521_v32 = vpack.c.bf16 %v1519_v27, %v1519_v27 }
 0xb5a   :  { %v1863_v33 = vpop.f32.mrf.mxu0 }
 0xb5b   :  { %1881 = vmatmul.mubr.bf16.vlgmr.msra.gmra.mxu1 %v1521_v32 }
 0xc1b   :  { %v1624_v35 = vpop.f32.mrf.mxu1 }
 0xc1c   :  { %v1625_v36 = vadd.f32 %v1703_v34, %v1624_v35 }
 0xc1d   :  { %v1882_v0 = vpop.f32.mrf.mxu1 }
 0xc1e   :  { %1630 = vst [vmem:[#allocation10] sm:$0x3] %v1625_v36 }
 0xc1f   :  { %v1627_v38 = vpop.f32.mrf.mxu1 }
 0xc20   :  { %2129 = shalt.err (!%p2126_p10)
}
 0xc21   :  { %1640 = dma.vmem_to_hbm [thread:$0]  %s1638_s23, 32, %s2564_s10, [#allocation4]   ;;  %v1883_v29 = vpop.f32.mrf.mxu1 }
 0xc22   :  { %2144 = dma.done.wait [#allocation4], 32  }
 0xc23   :  { %2145 = vsyncadd [#allocation4], 4294967264 }
 0xc24   :  { %1644 = vsyncpa [#allocation3], 1 }
 0xc25   :  { %1645 = vsyncpa [#allocation6], 1 }
 0xc26   :  { %1646 = vsyncpa [#allocation9], 1 }
 0xc27   :  { %1647 = vsyncpa [#allocation4], 1 }

</bundles_post_ra>
